<compile_context>
chip_gen: v7x
topology: tpu7x:2x2x1
jax: 0.10.0
libtpu: 0.0.40
codegen_flags: <defaults>
</compile_context>

<pallas_src>
import functools

import jax
import jax.numpy as jnp
from jax.experimental import pallas as pl
from jax.experimental.pallas import tpu as pltpu


def _round_up(a, m):
    return ((a + m - 1) // m) * m


def _cdiv(a, b):
    return (a + b - 1) // b


def _freq_bands(N_freqs, logscale):
    if logscale:
        return tuple(float(2.0 ** k) for k in range(N_freqs))
    if N_freqs == 1:
        return (1.0,)
    hi = 2.0 ** (N_freqs - 1)
    step = (hi - 1.0) / (N_freqs - 1)
    return tuple(1.0 + step * i for i in range(N_freqs))


_SUB = 512  # lane sub-chunk processed per inner (unrolled) iteration


def _fused_kernel(x_ref, o_ref, *, freq_bands):
    """Lane-dense compute, transposed in-registers, torch-layout store.

    x_ref: (C, block_b)               batch on lanes (full 128-lane vregs)
    o_ref: (block_b, out_channels)    torch-native layout, contiguous HBM rows
    """
    c, bb = x_ref.shape
    oc = o_ref.shape[1]
    n_freqs = len(freq_bands)
    pad_rows = (-oc) % 8  # sublane-align the transpose operand
    sub = min(_SUB, bb)
    for start in range(0, bb, sub):
        size = min(sub, bb - start)
        xc = x_ref[:, start:start + size]                      # (C, size) f32
        # Packed angles: row k*C + i -> freq_k * x_i (one EUP-dense block).
        ang = jnp.concatenate([f * xc for f in freq_bands], axis=0)
        s = jnp.sin(ang)                                       # (N*C, size)
        co = jnp.cos(ang)                                      # (N*C, size)
        pieces = [xc]
        for k in range(n_freqs):                               # torch cat order
            pieces.append(s[k * c:(k + 1) * c])
            pieces.append(co[k * c:(k + 1) * c])
        if pad_rows:
            pieces.append(jnp.zeros((pad_rows, size), jnp.float32))
        lane_dense = jnp.concatenate(pieces, axis=0)           # (oc+pad, size)
        chunk_t = jnp.transpose(lane_dense, (1, 0))            # (size, oc+pad) on XLU
        o_ref[start:start + size, :] = chunk_t[:, :oc].astype(o_ref.dtype)


def _lanedense_kernel(x_ref, o_ref, *, freq_bands):
    """Fallback: lane-dense output (out_channels, B) with per-segment stores."""
    c, bb = x_ref.shape
    sub = min(1024, bb)
    for start in range(0, bb, sub):
        size = min(sub, bb - start)
        xc = x_ref[:, start:start + size]
        o_ref[0:c, start:start + size] = xc.astype(o_ref.dtype)
        row = c
        for f in freq_bands:
            a = f * xc
            o_ref[row:row + c, start:start + size] = jnp.sin(a).astype(o_ref.dtype)
            row += c
            o_ref[row:row + c, start:start + size] = jnp.cos(a).astype(o_ref.dtype)
            row += c


def _choose_block(B, max_rows):
    """Block rows: multiple of 128, >=2 grid steps when worthwhile, small tail."""
    max_rows = max(128, (max_rows // 128) * 128)
    nblocks = _cdiv(B, max_rows)
    if B >= 1024:
        nblocks = max(nblocks, 2)          # feed both v7x TensorCores
    blk = _round_up(_cdiv(B, nblocks), 128)
    blk = min(blk, (B // 128) * 128)       # never exceed the array extent
    return max(blk, 128)


def _compiler_params():
    return pltpu.CompilerParams(
        dimension_semantics=("parallel",),
        vmem_limit_bytes=40 * 1024 * 1024,
    )


def _cost(rows, C, OC, n_freqs):
    return pl.CostEstimate(
        flops=4 * rows * OC,
        transcendentals=2 * rows * C * n_freqs,
        bytes_accessed=4 * rows * (C + OC),
    )


def _call_fused(xt, B, C, OC, freq_bands, block_b, grid_b, out_dtype):
    kern = functools.partial(_fused_kernel, freq_bands=freq_bands)
    return pl.pallas_call(
        kern,
        out_shape=jax.ShapeDtypeStruct((B, OC), out_dtype),
        grid_spec=pltpu.PrefetchScalarGridSpec(
            num_scalar_prefetch=0,
            grid=(grid_b,),
            in_specs=[pl.BlockSpec((C, block_b), lambda i: (0, i))],
            out_specs=pl.BlockSpec((block_b, OC), lambda i: (i, 0)),
        ),
        compiler_params=_compiler_params(),
        cost_estimate=_cost(grid_b * block_b, C, OC, len(freq_bands)),
    )(xt)


def _call_lanedense(xt, B, C, OC, freq_bands, block_b, grid_b, out_dtype):
    kern = functools.partial(_lanedense_kernel, freq_bands=freq_bands)
    out_t = pl.pallas_call(
        kern,
        out_shape=jax.ShapeDtypeStruct((OC, B), out_dtype),
        grid_spec=pltpu.PrefetchScalarGridSpec(
            num_scalar_prefetch=0,
            grid=(grid_b,),
            in_specs=[pl.BlockSpec((C, block_b), lambda i: (0, i))],
            out_specs=pl.BlockSpec((OC, block_b), lambda i: (0, i)),
        ),
        compiler_params=_compiler_params(),
        cost_estimate=_cost(grid_b * block_b, C, OC, len(freq_bands)),
    )(xt)
    return jnp.transpose(out_t)  # extra HBM pass, only used as a fallback


def pos_embedding(x, N_freqs, logscale=True, max_block_rows=8192, out_dtype=None):
    """JAX/Pallas equivalent of PosEmbedding.forward.

    x: (B, in_channels) float32
    returns: (B, in_channels * (2 * N_freqs + 1))
    """
    B, C = x.shape
    if out_dtype is None:
        out_dtype = x.dtype  # optionally pass jnp.bfloat16 to halve output writes
    OC = C * (2 * N_freqs + 1)
    xf = x.astype(jnp.float32)

    if B < 128:  # tiny batches: pad to one minimal block, slice afterwards
        xp = jnp.pad(xf, ((0, 128 - B), (0, 0)))
        return pos_embedding(xp, N_freqs, logscale, max_block_rows, out_dtype)[:B]

    freq_bands = _freq_bands(N_freqs, logscale)
    block_b = _choose_block(B, max_block_rows)
    grid_b = _cdiv(B, block_b)

    # Cheap input transpose (batch -> lanes); it is ~10x smaller than the
    # output and keeps every in-kernel trig op on full 128-lane vregs.
    xt = jnp.transpose(xf)  # (C, B)

    try:
        return _call_fused(xt, B, C, OC, freq_bands, block_b, grid_b, out_dtype)
    except Exception:
        # TODO(synk): drop this fallback once the in-kernel XLU transpose is
        # confirmed supported on all deployed Mosaic toolchains.
        return _call_lanedense(xt, B, C, OC, freq_bands, block_b, grid_b, out_dtype)


def pos_embedding_ref(x, N_freqs, logscale=True):
    """Pure-JAX reference (mirrors the PyTorch forward)."""
    if logscale:
        freq_bands = 2.0 ** jnp.linspace(0.0, N_freqs - 1, N_freqs)
    else:
        freq_bands = jnp.linspace(1.0, 2.0 ** (N_freqs - 1), N_freqs)
    out = [x]
    for freq in freq_bands:
        for func in (jnp.sin, jnp.cos):
            out.append(func(freq * x))
    return jnp.concatenate(out, axis=-1)


if __name__ == "__main__":
    C, N_freqs = 3, 4  # NeRF-like: xyz input, 4 frequencies
    OC = C * (2 * N_freqs + 1)

    # Main case: clean batch.
    x = jax.random.normal(jax.random.PRNGKey(0), (256, C), dtype=jnp.float32)
    out = jax.block_until_ready(pos_embedding(x, N_freqs, logscale=True))
    ref = pos_embedding_ref(x, N_freqs, logscale=True)
    assert out.shape == (256, OC), out.shape
    assert jnp.allclose(out, ref, atol=1e-4, rtol=1e-4), "mismatch vs reference"

    # Ragged batch (partial final grid block) + linear frequency bands.
    x2 = jax.random.normal(jax.random.PRNGKey(1), (200, C), dtype=jnp.float32)
    out2 = jax.block_until_ready(pos_embedding(x2, N_freqs, logscale=False))
    ref2 = pos_embedding_ref(x2, N_freqs, logscale=False)
    assert out2.shape == (200, OC), out2.shape
    assert jnp.allclose(out2, ref2, atol=1e-4, rtol=1e-4), "mismatch (ragged)"

    # Tiny batch path.
    x3 = jax.random.normal(jax.random.PRNGKey(2), (64, C), dtype=jnp.float32)
    out3 = jax.block_until_ready(pos_embedding(x3, N_freqs))
    ref3 = pos_embedding_ref(x3, N_freqs)
    assert out3.shape == (64, OC), out3.shape
    assert jnp.allclose(out3, ref3, atol=1e-4, rtol=1e-4), "mismatch (tiny)"

    print("KERNEL_OK")
</pallas_src>

<mosaic_0001>
module attributes {stable_mosaic.version = 11 : i64} {
  func.func @_fused_kernel(%arg0: i32, %arg1: memref<3x256xf32, #tpu.memory_space<vmem>>, %arg2: memref<256x27xf32, #tpu.memory_space<vmem>>) attributes {dimension_semantics = [#tpu.dimension_semantics<parallel>], iteration_bounds = array<i64: 1>, scalar_prefetch = 0 : i64, scratch_operands = 0 : i64, tpu.core_type = #tpu.core_type<tc>, window_params = [{transform_indices = @transform_0, window_bounds = array<i64: 3, 256>}, {transform_indices = @transform_1, window_bounds = array<i64: 256, 27>}]} {
    %c0 = arith.constant 0 : index
    %c0_0 = arith.constant 0 : index
    %0 = vector.load %arg1[%c0, %c0_0] : memref<3x256xf32, #tpu.memory_space<vmem>>, vector<3x256xf32>
    %cst = arith.constant 1.000000e+00 : f32
    %1 = vector.broadcast %cst : f32 to vector<3x256xf32>
    %2 = arith.mulf %1, %0 : vector<3x256xf32>
    %cst_1 = arith.constant 2.000000e+00 : f32
    %3 = vector.broadcast %cst_1 : f32 to vector<3x256xf32>
    %4 = arith.mulf %3, %0 : vector<3x256xf32>
    %cst_2 = arith.constant 4.000000e+00 : f32
    %5 = vector.broadcast %cst_2 : f32 to vector<3x256xf32>
    %6 = arith.mulf %5, %0 : vector<3x256xf32>
    %cst_3 = arith.constant 8.000000e+00 : f32
    %7 = vector.broadcast %cst_3 : f32 to vector<3x256xf32>
    %8 = arith.mulf %7, %0 : vector<3x256xf32>
    %9 = tpu.concatenate %2, %4, %6, %8 in 0 : vector<3x256xf32>, vector<3x256xf32>, vector<3x256xf32>, vector<3x256xf32> -> vector<12x256xf32>
    %10 = math.sin %9 : vector<12x256xf32>
    %11 = math.cos %9 : vector<12x256xf32>
    %12 = vector.extract_strided_slice %10 {offsets = [0, 0], sizes = [3, 256], strides = [1, 1]} : vector<12x256xf32> to vector<3x256xf32>
    %13 = vector.extract_strided_slice %11 {offsets = [0, 0], sizes = [3, 256], strides = [1, 1]} : vector<12x256xf32> to vector<3x256xf32>
    %14 = vector.extract_strided_slice %10 {offsets = [3, 0], sizes = [3, 256], strides = [1, 1]} : vector<12x256xf32> to vector<3x256xf32>
    %15 = vector.extract_strided_slice %11 {offsets = [3, 0], sizes = [3, 256], strides = [1, 1]} : vector<12x256xf32> to vector<3x256xf32>
    %16 = vector.extract_strided_slice %10 {offsets = [6, 0], sizes = [3, 256], strides = [1, 1]} : vector<12x256xf32> to vector<3x256xf32>
    %17 = vector.extract_strided_slice %11 {offsets = [6, 0], sizes = [3, 256], strides = [1, 1]} : vector<12x256xf32> to vector<3x256xf32>
    %18 = vector.extract_strided_slice %10 {offsets = [9, 0], sizes = [3, 256], strides = [1, 1]} : vector<12x256xf32> to vector<3x256xf32>
    %19 = vector.extract_strided_slice %11 {offsets = [9, 0], sizes = [3, 256], strides = [1, 1]} : vector<12x256xf32> to vector<3x256xf32>
    %cst_4 = arith.constant 0.000000e+00 : f32
    %20 = vector.broadcast %cst_4 : f32 to vector<5x256xf32>
    %21 = tpu.concatenate %0, %12, %13, %14, %15, %16, %17, %18, %19, %20 in 0 : vector<3x256xf32>, vector<3x256xf32>, vector<3x256xf32>, vector<3x256xf32>, vector<3x256xf32>, vector<3x256xf32>, vector<3x256xf32>, vector<3x256xf32>, vector<3x256xf32>, vector<5x256xf32> -> vector<32x256xf32>
    %22 = tpu.transpose %21, [1, 0] : vector<32x256xf32> -> vector<256x32xf32>
    %23 = vector.extract_strided_slice %22 {offsets = [0, 0], sizes = [256, 27], strides = [1, 1]} : vector<256x32xf32> to vector<256x27xf32>
    %c0_5 = arith.constant 0 : index
    %c0_6 = arith.constant 0 : index
    %24 = vector.load %arg2[%c0_5, %c0_6] : memref<256x27xf32, #tpu.memory_space<vmem>>, vector<256x27xf32>
    tpu.vector_store %arg2[%c0_5, %c0_6], %23 {strides = array<i32>} : memref<256x27xf32, #tpu.memory_space<vmem>>, vector<256x27xf32>,
    return
  }
  func.func @transform_0(%arg0: i32) -> (i32, i32) {
    %c0_i32 = arith.constant 0 : i32
    %c0_i32_0 = arith.constant 0 : i32
    return %c0_i32, %arg0 : i32, i32
  }
  func.func @transform_1(%arg0: i32) -> (i32, i32) {
    %c0_i32 = arith.constant 0 : i32
    %c0_i32_0 = arith.constant 0 : i32
    return %arg0, %c0_i32 : i32, i32
  }
}

module attributes {stable_mosaic.version = 11 : i64} {
  func.func @_lanedense_kernel(%arg0: i32, %arg1: memref<3x256xf32, #tpu.memory_space<vmem>>, %arg2: memref<27x256xf32, #tpu.memory_space<vmem>>) attributes {dimension_semantics = [#tpu.dimension_semantics<parallel>], iteration_bounds = array<i64: 1>, scalar_prefetch = 0 : i64, scratch_operands = 0 : i64, tpu.core_type = #tpu.core_type<tc>, window_params = [{transform_indices = @transform_0, window_bounds = array<i64: 3, 256>}, {transform_indices = @transform_1, window_bounds = array<i64: 27, 256>}]} {
    %c0 = arith.constant 0 : index
    %c0_0 = arith.constant 0 : index
    %0 = vector.load %arg1[%c0, %c0_0] : memref<3x256xf32, #tpu.memory_space<vmem>>, vector<3x256xf32>
    %c0_1 = arith.constant 0 : index
    %c0_2 = arith.constant 0 : index
    %1 = vector.load %arg2[%c0_1, %c0_2] : memref<27x256xf32, #tpu.memory_space<vmem>>, vector<3x256xf32>
    tpu.vector_store %arg2[%c0_1, %c0_2], %0 {strides = array<i32>} : memref<27x256xf32, #tpu.memory_space<vmem>>, vector<3x256xf32>,
    %cst = arith.constant 1.000000e+00 : f32
    %2 = vector.broadcast %cst : f32 to vector<3x256xf32>
    %3 = arith.mulf %2, %0 : vector<3x256xf32>
    %4 = math.sin %3 : vector<3x256xf32>
    %c3 = arith.constant 3 : index
    %c0_3 = arith.constant 0 : index
    %5 = vector.load %arg2[%c3, %c0_3] : memref<27x256xf32, #tpu.memory_space<vmem>>, vector<3x256xf32>
    tpu.vector_store %arg2[%c3, %c0_3], %4 {strides = array<i32>} : memref<27x256xf32, #tpu.memory_space<vmem>>, vector<3x256xf32>,
    %6 = math.cos %3 : vector<3x256xf32>
    %c6 = arith.constant 6 : index
    %c0_4 = arith.constant 0 : index
    %7 = vector.load %arg2[%c6, %c0_4] : memref<27x256xf32, #tpu.memory_space<vmem>>, vector<3x256xf32>
    tpu.vector_store %arg2[%c6, %c0_4], %6 {strides = array<i32>} : memref<27x256xf32, #tpu.memory_space<vmem>>, vector<3x256xf32>,
    %cst_5 = arith.constant 2.000000e+00 : f32
    %8 = vector.broadcast %cst_5 : f32 to vector<3x256xf32>
    %9 = arith.mulf %8, %0 : vector<3x256xf32>
    %10 = math.sin %9 : vector<3x256xf32>
    %c9 = arith.constant 9 : index
    %c0_6 = arith.constant 0 : index
    %11 = vector.load %arg2[%c9, %c0_6] : memref<27x256xf32, #tpu.memory_space<vmem>>, vector<3x256xf32>
    tpu.vector_store %arg2[%c9, %c0_6], %10 {strides = array<i32>} : memref<27x256xf32, #tpu.memory_space<vmem>>, vector<3x256xf32>,
    %12 = math.cos %9 : vector<3x256xf32>
    %c12 = arith.constant 12 : index
    %c0_7 = arith.constant 0 : index
    %13 = vector.load %arg2[%c12, %c0_7] : memref<27x256xf32, #tpu.memory_space<vmem>>, vector<3x256xf32>
    tpu.vector_store %arg2[%c12, %c0_7], %12 {strides = array<i32>} : memref<27x256xf32, #tpu.memory_space<vmem>>, vector<3x256xf32>,
    %cst_8 = arith.constant 4.000000e+00 : f32
    %14 = vector.broadcast %cst_8 : f32 to vector<3x256xf32>
    %15 = arith.mulf %14, %0 : vector<3x256xf32>
    %16 = math.sin %15 : vector<3x256xf32>
    %c15 = arith.constant 15 : index
    %c0_9 = arith.constant 0 : index
    %17 = vector.load %arg2[%c15, %c0_9] : memref<27x256xf32, #tpu.memory_space<vmem>>, vector<3x256xf32>
    tpu.vector_store %arg2[%c15, %c0_9], %16 {strides = array<i32>} : memref<27x256xf32, #tpu.memory_space<vmem>>, vector<3x256xf32>,
    %18 = math.cos %15 : vector<3x256xf32>
    %c18 = arith.constant 18 : index
    %c0_10 = arith.constant 0 : index
    %19 = vector.load %arg2[%c18, %c0_10] : memref<27x256xf32, #tpu.memory_space<vmem>>, vector<3x256xf32>
    tpu.vector_store %arg2[%c18, %c0_10], %18 {strides = array<i32>} : memref<27x256xf32, #tpu.memory_space<vmem>>, vector<3x256xf32>,
    %cst_11 = arith.constant 8.000000e+00 : f32
    %20 = vector.broadcast %cst_11 : f32 to vector<3x256xf32>
    %21 = arith.mulf %20, %0 : vector<3x256xf32>
    %22 = math.sin %21 : vector<3x256xf32>
    %c21 = arith.constant 21 : index
    %c0_12 = arith.constant 0 : index
    %23 = vector.load %arg2[%c21, %c0_12] : memref<27x256xf32, #tpu.memory_space<vmem>>, vector<3x256xf32>
    tpu.vector_store %arg2[%c21, %c0_12], %22 {strides = array<i32>} : memref<27x256xf32, #tpu.memory_space<vmem>>, vector<3x256xf32>,
    %24 = math.cos %21 : vector<3x256xf32>
    %c24 = arith.constant 24 : index
    %c0_13 = arith.constant 0 : index
    %25 = vector.load %arg2[%c24, %c0_13] : memref<27x256xf32, #tpu.memory_space<vmem>>, vector<3x256xf32>
    tpu.vector_store %arg2[%c24, %c0_13], %24 {strides = array<i32>} : memref<27x256xf32, #tpu.memory_space<vmem>>, vector<3x256xf32>,
    return
  }
  func.func @transform_0(%arg0: i32) -> (i32, i32) {
    %c0_i32 = arith.constant 0 : i32
    %c0_i32_0 = arith.constant 0 : i32
    return %c0_i32, %arg0 : i32, i32
  }
  func.func @transform_1(%arg0: i32) -> (i32, i32) {
    %c0_i32 = arith.constant 0 : i32
    %c0_i32_0 = arith.constant 0 : i32
    return %c0_i32, %arg0 : i32, i32
  }
}

</mosaic_0001>

<bundles_post_ra>
// kernel: tpu_custom_call.1
= control target key start
LH: loop header
LB: loop body
LE: loop exit
PB: predicated region body
PF: predicated region fallthrough
CT: control target
= control target key end

     0   :  { %6 = vsyncpa [#allocation3], 0  ;;  %s1151_s6 = smov [#allocation2]   ;;  %s1730_s0 = inlined_call_operand.hbm [shape: f32[3,256], index: 0, kind: input, shape index: {}]   ;;  %s1731_s1 = inlined_call_operand.vmem [shape: f32[256,27], index: 1, kind: output, shape index: {}]  }
   0x1   :  { %s13_s7 = sshll.u32 %s1151_s6, 4  ;;  %s1127_s10 = scalar_lea.hbm %s1730_s0, 128  ;;  %s14_s7 = int_to_ptr.vmem [resolvable:$true] %s13_s7 }
   0x2   :  { %p1128_p0 = scmp.ne.s32.totalorder %s1730_s0, %s1127_s10  ;;  %p1131_p1 = scmp.lt.u32.totalorder %s1127_s10, %s1730_s0 }
   0x4   :  { %p1133_p2 = pnand %p1131_p1, %p1128_p0 }
   0x6   :  { %1136 = shalt.err (!%p1133_p2)
}
   0x7   :  { %s1137_s15 = scalar_lea.vmem %s14_s7, 128  ;;  %p1142_p4 = scmp.lt.s32.totalorder %s14_s7, %s14_s7 }
   0x8   :  { %p1138_p3 = scmp.ne.s32.totalorder %s14_s7, %s1137_s15  ;;  %p1143_p5 = scmp.lt.s32.totalorder %s1137_s15, %s1137_s15 }
   0xa   :  { %p1144_p6 = por %p1143_p5, %p1142_p4 }
   0xc   :  { %p1145_p7 = pnand %p1144_p6, %p1138_p3 }
   0xe   :  { %1148 = shalt.err (!%p1145_p7)
}
   0xf   :  { %16 = dma.hbm_to_vmem [thread:$0]  %s1730_s0, 128, %s14_s7, [#allocation3]  }
  0x10   :  { %1149 = dma.done.wait [#allocation3], 128  }
  0x11   :  { %1150 = vsyncadd [#allocation3], 4294967168  ;;  %v1180_v0 = vld [vmem:[#allocation2] sm:$0x77]  ;;  %vm45_vm0 = vcmask 1042432   ;;  %vm48_vm1 = vcmask 1045504  }
  0x12   :  { %v21_v1 = vmul.f32 2.0, %v1180_v0  ;;  %v22_v2 = vmul.f32 4.0, %v1180_v0  ;;  %vm51_vm2 = vcmask 1040384   ;;  %v1185_v3 = vmul.f32 8.0, %v1180_v0 }
  0x13   :  { %v1189_v8 = vcombine.high %v1180_v0, %v1180_v0  ;;  %v1152_v42 = vmov 683565275   ;;  %v1153_v44 = vmov 2475754826   ;;  %v1154_v46 = vmov 2131351028  }
  0x14   :  { %v29_v4 = vrot.slane %v21_v1, 5  ;;  %v34_v5 = vcombine.high %v22_v2, %v22_v2  ;;  %v35_v6 = vrot.slane %v22_v2, 2  ;;  %v28_v7 = vcombine.high %v21_v1, %v21_v1 }
  0x15   :  { %v41_v9 = vrot.slane %v1185_v3, 7  ;;  %v40_v37 = vcombine.high %v1185_v3, %v1185_v3  ;;  %v1155_v48 = vmov 2102212464   ;;  %v1156_v50 = vmov 920167782  }
  0x16   :  { %v1192_v10 = vrot.slane %v34_v5, 2  ;;  %v46_v11 = vsel %vm45_vm0, %v1180_v0, %v29_v4  ;;  %v30_v12 = vrot.slane %v28_v7, 5  ;;  %v1157_v57 = vmov 1326507024  }
  0x17   :  { %v1197_v13 = vsel %vm48_vm1, %v46_v11, %v35_v6  ;;  %v1200_v14 = vsel %vm51_vm2, %v35_v6, %v41_v9 }
  0x18   :  { %v54_v15 = vand.u32 2147483647, %v1197_v13  ;;  %v57_v16 = vand.u32 2139095040, %v1197_v13  ;;  %v47_v17 = vsel %vm45_vm0, %v1189_v8, %v30_v12  ;;  %v265_v18 = vand.u32 2139095040, %v1200_v14 }
  0x19   :  { %v1209_v20 = vsel %vm48_vm1, %v47_v17, %v1192_v10 }
  0x1a   :  { %v58_v19 = vshrl.u32 %v57_v16, 23  ;;  %v61_v21 = vand.u32 8388607, %v54_v15  ;;  %v158_v22 = vand.u32 2147483647, %v1209_v20  ;;  %v161_v23 = vand.u32 2139095040, %v1209_v20 }
  0x1b   :  { %v266_v25 = vshrl.u32 %v265_v18, 23 }
  0x1c   :  { %v1054_v24 = vadd.s32 4294967169, %v58_v19  ;;  %v162_v26 = vshrl.u32 %v161_v23, 23  ;;  %v165_v27 = vand.u32 8388607, %v158_v22  ;;  %v62_v29 = vor.u32 8388608, %v61_v21 }
  0x1d   :  { %v1062_v32 = vadd.s32 4294967169, %v266_v25 }
  0x1e   :  { %v64_v28 = vadd.s32 1, %v1054_v24  ;;  %v1058_v30 = vadd.s32 4294967169, %v162_v26  ;;  %v166_v31 = vor.u32 8388608, %v165_v27  ;;  %v1219_v38 = vshll.u32 %v62_v29, 8 }
  0x1f   :  { %v1223_v40 = vadd.s32 1, %v1062_v32 }
  0x20   :  { %vm65_vm3 = vcmp.gt.s32.totalorder %v64_v28, 0  ;;  %v168_v34 = vadd.s32 1, %v1058_v30  ;;  %v1221_v39 = vshll.u32 %v166_v31, 8 }
  0x21   :  { %v66_v33 = vsel %vm65_vm3, %v64_v28, 0  ;;  %vm273_vm11 = vcmp.gt.s32.totalorder %v1223_v40, 0  ;;  %vm56_vm3 = vcmp.lt.s32.totalorder %v1197_v13, 0 }
  0x22   :  { %v67_v35 = vshrl.u32 %v66_v33, 5  ;;  %v68_v36 = vand.u32 31, %v66_v33  ;;  %vm169_vm4 = vcmp.gt.s32.totalorder %v168_v34, 0 }
  0x23   :  { %v170_v62 = vsel %vm169_vm4, %v168_v34, 0  ;;  %vm1310_vm4 = vcmp.le.f32.partialorder %v54_v15, 0.7853982 }
  0x24   :  { %v69_v41 = vsub.s32 32, %v68_v36  ;;  %v71_v43 = vshll.u32 %v1152_v42, %v68_v36  ;;  %v74_v45 = vshll.u32 %v1153_v44, %v68_v36  ;;  %v77_v47 = vshll.u32 %v1154_v46, %v68_v36 }
  0x25   :  { %v80_v49 = vshll.u32 %v1155_v48, %v68_v36  ;;  %v83_v51 = vshll.u32 %v1156_v50, %v68_v36  ;;  %vm86_vm5 = vcmp.lt.s32.totalorder %v67_v35, 1  ;;  %vm87_vm6 = vcmp.lt.s32.totalorder %v67_v35, 2 }
  0x26   :  { %v70_v52 = vshrl.u32 %v1152_v42, %v69_v41  ;;  %v72_v53 = vshrl.u32 %v1153_v44, %v69_v41  ;;  %v75_v54 = vshrl.u32 %v1154_v46, %v69_v41  ;;  %v78_v55 = vshrl.u32 %v1155_v48, %v69_v41 }
  0x27   :  { %v81_v56 = vshrl.u32 %v1156_v50, %v69_v41  ;;  %v84_v58 = vshrl.u32 %v1157_v57, %v69_v41  ;;  %vm88_vm7 = vcmp.lt.s32.totalorder %v67_v35, 3  ;;  %vm89_vm8 = vcmp.lt.s32.totalorder %v67_v35, 4 }
  0x28   :  { %v73_v59 = vor.u32 %v72_v53, %v71_v43  ;;  %v76_v60 = vor.u32 %v75_v54, %v74_v45  ;;  %v79_v61 = vor.u32 %v78_v55, %v77_v47  ;;  %v171_v2 = vshrl.u32 %v170_v62, 5 }
  0x29   :  { %v82_v63 = vor.u32 %v81_v56, %v80_v49  ;;  %v85_v1 = vor.u32 %v84_v58, %v83_v51  ;;  %v172_v4 = vand.u32 31, %v170_v62 }
  0x2a   :  { %v90_v5 = vsel %vm86_vm5, %v70_v52, %v73_v59  ;;  %v91_v6 = vsel %vm89_vm8, %v79_v61, 2102212464  ;;  %v94_v7 = vsel %vm86_vm5, %v73_v59, %v76_v60  ;;  %v98_v9 = vsel %vm86_vm5, %v76_v60, %v79_v61 }
  0x2b   :  { %v92_v11 = vsel %vm88_vm7, %v76_v60, %v91_v6  ;;  %v95_v12 = vsel %vm89_vm8, %v82_v63, 920167782  ;;  %v99_v16 = vsel %vm89_vm8, %v85_v1, 1326507024  ;;  %v173_v17 = vsub.s32 32, %v172_v4 }
  0x2c   :  { %v93_v18 = vsel %vm87_vm6, %v90_v5, %v92_v11  ;;  %v96_v19 = vsel %vm88_vm7, %v79_v61, %v95_v12  ;;  %v100_v21 = vsel %vm88_vm7, %v82_v63, %v99_v16  ;;  %v175_v23 = vshll.u32 %v1152_v42, %v172_v4 }
  0x2d   :  { %v97_v24 = vsel %vm87_vm6, %v94_v7, %v96_v19  ;;  %v101_v25 = vsel %vm87_vm6, %v98_v9, %v100_v21  ;;  %v109_v26 = vmul.u32 %v1219_v38, %v93_v18  ;;  %v174_v27 = vshrl.u32 %v1152_v42, %v173_v17 }
  0x2e   :  { %v1250_v28 = vmul.u32.u64.low %v1219_v38, %v101_v25  ;;  %v1251_v29 = vmul.u32.u64.high %v1219_v38, %v101_v25, %v1250_v28  ;;  %v1254_v30 = vmul.u32.u64.low %v1219_v38, %v97_v24  ;;  %v1255_v31 = vmul.u32.u64.high %v1219_v38, %v97_v24, %v1254_v30 }
  0x2f   :  { %v176_v32 = vshrl.u32 %v1153_v44, %v173_v17  ;;  %v178_v33 = vshll.u32 %v1153_v44, %v172_v4  ;;  %v179_v34 = vshrl.u32 %v1154_v46, %v173_v17  ;;  %v181_v35 = vshll.u32 %v1154_v46, %v172_v4 }
  0x30   :  { %v182_v36 = vshrl.u32 %v1155_v48, %v173_v17  ;;  %v184_v41 = vshll.u32 %v1155_v48, %v172_v4  ;;  %v185_v43 = vshrl.u32 %v1156_v50, %v173_v17  ;;  %v187_v45 = vshll.u32 %v1156_v50, %v172_v4 }
  0x31   :  { %v177_v47 = vor.u32 %v176_v32, %v175_v23  ;;  %v180_v38 = vor.u32 %v179_v34, %v178_v33  ;;  %v188_v49 = vshrl.u32 %v1157_v57, %v173_v17  ;;  %vm190_vm9 = vcmp.lt.s32.totalorder %v171_v2, 1 }
  0x32   :  { %vm111_vm10 = vc.u32 %v1251_v29, %v1254_v30  ;;  %v112_v51 = vadd.s32 1, %v1255_v31  ;;  %v183_v52 = vor.u32 %v182_v36, %v181_v35  ;;  %v186_v53 = vor.u32 %v185_v43, %v184_v41 }
  0x33   :  { %v189_v54 = vor.u32 %v188_v49, %v187_v45  ;;  %vm191_vm12 = vcmp.lt.s32.totalorder %v171_v2, 2  ;;  %vm192_vm13 = vcmp.lt.s32.totalorder %v171_v2, 3  ;;  %vm193_vm14 = vcmp.lt.s32.totalorder %v171_v2, 4 }
  0x34   :  { %v113_v55 = vsel %vm111_vm10, %v112_v51, %v1255_v31  ;;  %v194_v56 = vsel %vm190_vm9, %v174_v27, %v177_v47  ;;  %v198_v58 = vsel %vm190_vm9, %v177_v47, %v180_v38  ;;  %v195_v60 = vsel %vm193_vm14, %v183_v52, 2102212464 }
  0x35   :  { %v114_v59 = vadd.s32 %v113_v55, %v109_v26  ;;  %v199_v61 = vsel %vm193_vm14, %v186_v53, 920167782  ;;  %v202_v62 = vsel %vm190_vm9, %v180_v38, %v183_v52  ;;  %v196_v63 = vsel %vm192_vm13, %v180_v38, %v195_v60 }
  0x36   :  { %v200_v1 = vsel %vm192_vm13, %v183_v52, %v199_v61  ;;  %v203_v4 = vsel %vm193_vm14, %v189_v54, 1326507024  ;;  %v274_v5 = vsel %vm273_vm11, %v1223_v40, 0  ;;  %v262_v11 = vand.u32 2147483647, %v1200_v14 }
  0x37   :  { %v115_v6 = vadd.s32 536870912, %v114_v59  ;;  %v201_v7 = vsel %vm191_vm12, %v198_v58, %v200_v1  ;;  %v204_v9 = vsel %vm192_vm13, %v186_v53, %v203_v4  ;;  %v197_v12 = vsel %vm191_vm12, %v194_v56, %v196_v63 }
  0x38   :  { %v205_v16 = vsel %vm191_vm12, %v202_v62, %v204_v9  ;;  %v1283_v17 = vmul.u32.u64.low %v1221_v39, %v201_v7  ;;  %v1284_v18 = vmul.u32.u64.high %v1221_v39, %v201_v7, %v1283_v17  ;;  %v276_v40 = vand.u32 31, %v274_v5 }
  0x39   :  { %v116_v19 = vshrl.u32 %v115_v6, 30  ;;  %v1288_v21 = vmul.u32.u64.low %v1221_v39, %v205_v16  ;;  %v1289_v23 = vmul.u32.u64.high %v1221_v39, %v205_v16, %v1288_v21  ;;  %v42_v24 = vrot.slane %v40_v37, 7 }
  0x3a   :  { %v213_v26 = vmul.u32 %v1221_v39, %v197_v12  ;;  %v216_v2 = vadd.s32 1, %v1284_v18  ;;  %v269_v27 = vand.u32 8388607, %v262_v11  ;;  %v277_v28 = vsub.s32 32, %v276_v40 }
  0x3b   :  { %v117_v25 = vshll.u32 %v116_v19, 30  ;;  %vm215_vm15 = vc.u32 %v1289_v23, %v1283_v17  ;;  %v1303_v33 = vsel %vm51_vm2, %v1192_v10, %v42_v24  ;;  %v288_v34 = vshll.u32 %v1155_v48, %v276_v40 }
  0x3c   :  { %v217_v32 = vsel %vm215_vm15, %v216_v2, %v1284_v18  ;;  %v270_v39 = vor.u32 8388608, %v269_v27  ;;  %v289_v35 = vshrl.u32 %v1156_v50, %v277_v28  ;;  %v1314_v43 = vshrl.u32 %v274_v5, 5 }
  0x3d   :  { %v118_v31 = vsub.s32 %v114_v59, %v117_v25  ;;  %v218_v37 = vadd.s32 %v217_v32, %v213_v26  ;;  %v279_v10 = vshll.u32 %v1152_v42, %v276_v40  ;;  %v369_v45 = vand.u32 2139095040, %v1303_v33 }
  0x3e   :  { %v280_v38 = vshrl.u32 %v1153_v44, %v277_v28  ;;  %v282_v49 = vshll.u32 %v1153_v44, %v276_v40  ;;  %v283_v51 = vshrl.u32 %v1154_v46, %v277_v28  ;;  %v140_v53 = vsub.s32 4, %v116_v19 }
  0x3f   :  { %v120_v3 = vsub.s32 0, %v118_v31  ;;  %v219_v47 = vadd.s32 536870912, %v218_v37  ;;  %v285_v15 = vshll.u32 %v1154_v46, %v276_v40  ;;  %v286_v54 = vshrl.u32 %v1155_v48, %v277_v28 }
  0x40   :  { %v290_v56 = vor.u32 %v289_v35, %v288_v34  ;;  %v291_v58 = vshll.u32 %v1156_v50, %v276_v40  ;;  %v292_v59 = vshrl.u32 %v1157_v57, %v277_v28  ;;  %v110_v60 = vadd.s32 %v1254_v30, %v1251_v29 }
  0x41   :  { %v1055_v41 = vmin.u32 %v120_v3, %v118_v31  ;;  %v1323_v55 = vshrl.u32 %v219_v47, 30  ;;  %vm294_vm5 = vcmp.lt.s32.totalorder %v1314_v43, 1  ;;  %vm297_vm6 = vcmp.lt.s32.totalorder %v1314_v43, 4 }
  0x42   :  { %v281_v63 = vor.u32 %v280_v38, %v279_v10  ;;  %v284_v1 = vor.u32 %v283_v51, %v282_v49  ;;  %vm296_vm7 = vcmp.lt.s32.totalorder %v1314_v43, 3  ;;  %v141_v4 = vsel %vm56_vm3, %v140_v53, %v116_v19 }
  0x43   :  { %v122_v52 = vclz %v1055_v41  ;;  %v221_v62 = vshll.u32 %v1323_v55, 30  ;;  %v287_v5 = vor.u32 %v286_v54, %v285_v15  ;;  %v293_v6 = vor.u32 %v292_v59, %v291_v58 }
  0x44   :  { %v278_v29 = vshrl.u32 %v1152_v42, %v277_v28  ;;  %v303_v30 = vsel %vm297_vm6, %v290_v56, 920167782  ;;  %vm295_vm9 = vcmp.lt.s32.totalorder %v1314_v43, 2  ;;  %v143_v21 = vsel %vm1310_vm4, 0, %v141_v4 }
  0x45   :  { %v1056_v61 = vadd.s32 4294967294, %v122_v52  ;;  %v1335_v9 = vsub.s32 %v218_v37, %v221_v62  ;;  %vm160_vm10 = vcmp.lt.s32.totalorder %v1209_v20, 0  ;;  %v299_v40 = vsel %vm297_vm6, %v287_v5, 2102212464 }
  0x46   :  { %v302_v24 = vsel %vm294_vm5, %v281_v63, %v284_v1  ;;  %v304_v2 = vsel %vm296_vm7, %v287_v5, %v303_v30  ;;  %v307_v27 = vsel %vm297_vm6, %v293_v6, 1326507024  ;;  %v306_v32 = vsel %vm294_vm5, %v284_v1, %v287_v5 }
  0x47   :  { %vm1057_vm8 = vcmp.lt.s32.totalorder %v1056_v61, 0  ;;  %v224_v19 = vsub.s32 0, %v1335_v9  ;;  %v310_v3 = vshll.u32 %v270_v39, 8  ;;  %vm1360_vm11 = vcmp.le.f32.partialorder %v158_v22, 0.7853982 }
  0x48   :  { %v125_v7 = vsel %vm1057_vm8, 0, %v1056_v61  ;;  %v300_v41 = vsel %vm296_vm7, %v284_v1, %v299_v40  ;;  %v308_v10 = vsel %vm296_vm7, %v290_v56, %v307_v27  ;;  %v147_v47 = vadd.s32 3, %v143_v21 }
  0x49   :  { %v126_v12 = vsub.s32 32, %v125_v7  ;;  %v127_v16 = vshll.u32 %v118_v31, %v125_v7  ;;  %v130_v18 = vsub.s32 4294967266, %v125_v7  ;;  %v1059_v28 = vmin.u32 %v224_v19, %v1335_v9 }
  0x4a   :  { %v298_v31 = vsel %vm294_vm5, %v278_v29, %v281_v63  ;;  %v244_v49 = vsub.s32 4, %v1323_v55  ;;  %v305_v39 = vsel %vm295_vm9, %v302_v24, %v304_v2  ;;  %v309_v22 = vsel %vm295_vm9, %v306_v32, %v308_v10 }
  0x4b   :  { %v128_v25 = vshrl.u32 %v110_v60, %v126_v12  ;;  %v131_v26 = vadd.s32 127, %v130_v18  ;;  %v226_v38 = vclz %v1059_v28  ;;  %v370_v53 = vshrl.u32 %v369_v45, 23 }
  0x4c   :  { %v301_v54 = vsel %vm295_vm9, %v298_v31, %v300_v41  ;;  %v1375_v58 = vmul.u32.u64.low %v310_v3, %v309_v22  ;;  %v1376_v59 = vmul.u32.u64.high %v310_v3, %v309_v22, %v1375_v58  ;;  %v1382_v63 = vand.u32 3, %v147_v47 }
  0x4d   :  { %v129_v37 = vor.u32 %v128_v25, %v127_v16  ;;  %v132_v34 = vshll.u32 %v131_v26, 23  ;;  %v1060_v15 = vadd.s32 4294967294, %v226_v38  ;;  %v1066_v62 = vadd.s32 4294967169, %v370_v53 }
  0x4e   :  { %v1378_v60 = vmul.u32.u64.low %v310_v3, %v305_v39  ;;  %v1379_v61 = vmul.u32.u64.high %v310_v3, %v305_v39, %v1378_v60  ;;  %v1384_v1 = vand.u32 3, %v143_v21  ;;  %v214_v45 = vadd.s32 %v1283_v17, %v1289_v23 }
  0x4f   :  { %v133_v51 = vor.u32 4788187, %v132_v34  ;;  %v136_v52 = vcvt.s32.f32 %v129_v37  ;;  %vm1061_vm12 = vcmp.lt.s32.totalorder %v1060_v15, 0  ;;  %v245_v5 = vsel %vm160_vm10, %v244_v49, %v1323_v55 }
  0x50   :  { %v229_v43 = vsel %vm1061_vm12, 0, %v1060_v15  ;;  %v376_v6 = vadd.s32 1, %v1066_v62  ;;  %v317_v12 = vmul.u32 %v310_v3, %v301_v54  ;;  %vm319_vm13 = vc.u32 %v1376_v59, %v1378_v60 }
  0x51   :  { %v134_v56 = vand.u32 2147483647, %v133_v51  ;;  %v230_v7 = vsub.s32 32, %v229_v43  ;;  %v231_v29 = vshll.u32 %v1335_v9, %v229_v43  ;;  %v234_v30 = vsub.s32 4294967266, %v229_v43 }
  0x52   :  { %v320_v18 = vadd.s32 1, %v1379_v61  ;;  %vm377_vm14 = vcmp.gt.s32.totalorder %v376_v6, 0  ;;  %v247_v21 = vsel %vm1360_vm11, 0, %v245_v5  ;;  %vm146_vm15 = vweird.f32 %v1197_v13 }
  0x53   :  { %v137_v4 = vmul.f32 %v136_v52, %v134_v56  ;;  %v232_v17 = vshrl.u32 %v214_v45, %v230_v7  ;;  %v235_v23 = vadd.s32 127, %v234_v30  ;;  %v378_v19 = vsel %vm377_vm14, %v376_v6, 0 }
  0x54   :  { %v321_v9 = vsel %vm319_vm13, %v320_v18, %v1379_v61  ;;  %v1400_v40 = vshrl.u32 %v378_v19, 5  ;;  %v380_v24 = vand.u32 31, %v378_v19  ;;  %v366_v15 = vand.u32 2147483647, %v1303_v33 }
  0x55   :  { %v138_v16 = vxor.u32 2147483648, %v137_v4  ;;  %v233_v26 = vor.u32 %v232_v17, %v231_v29  ;;  %v236_v2 = vshll.u32 %v235_v23, 23  ;;  %v322_v27 = vadd.s32 %v321_v9, %v317_v12 }
  0x56   :  { %v381_v28 = vsub.s32 32, %v380_v24  ;;  %v383_v31 = vshll.u32 %v1152_v42, %v380_v24  ;;  %v386_v32 = vshll.u32 %v1153_v44, %v380_v24  ;;  %v389_v47 = vshll.u32 %v1154_v46, %v380_v24 }
  0x57   :  { %v139_v55 = vsel %vm56_vm3, %v138_v16, %v137_v4  ;;  %v237_v3 = vor.u32 4788187, %v236_v2  ;;  %v240_v37 = vcvt.s32.f32 %v233_v26  ;;  %v323_v34 = vadd.s32 536870912, %v322_v27 }
  0x58   :  { %v142_v25 = vsel %vm1310_vm4, %v1197_v13, %v139_v55  ;;  %v382_v41 = vshrl.u32 %v1152_v42, %v381_v28  ;;  %v384_v10 = vshrl.u32 %v1153_v44, %v381_v28  ;;  %v387_v36 = vshrl.u32 %v1154_v46, %v381_v28 }
  0x59   :  { %1111 = vcosq.f32 %v142_v25  ;;  %v238_v38 = vand.u32 2147483647, %v237_v3  ;;  %v1411_v49 = vshrl.u32 %v323_v34, 30  ;;  %v390_v39 = vshrl.u32 %v1155_v48, %v381_v28 }
  0x5a   :  { %1113 = vsinq.f32 %v142_v25  ;;  %v392_v51 = vshll.u32 %v1155_v48, %v380_v24  ;;  %v385_v52 = vor.u32 %v384_v10, %v383_v31  ;;  %v1415_v22 = vor.u32 %v387_v36, %v386_v32 }
  0x5b   :  { %v393_v53 = vshrl.u32 %v1156_v50, %v381_v28  ;;  %v1419_v42 = vshll.u32 %v1156_v50, %v380_v24  ;;  %v241_v44 = vmul.f32 %v240_v37, %v238_v38  ;;  %v325_v46 = vshll.u32 %v1411_v49, 30 }
  0x5c   :  { %v1424_v54 = vor.u32 %v390_v39, %v389_v47  ;;  %vm564_vm3 = vcmp.lt.s32.totalorder %v1384_v1, 2  ;;  %v251_v48 = vadd.s32 3, %v247_v21  ;;  %v1430_v56 = vshrl.u32 %v1157_v57, %v381_v28 }
  0x5d   :  { %v1427_v58 = vor.u32 %v393_v53, %v392_v51  ;;  %vm565_vm4 = vcmp.eq.s32.totalorder %v1384_v1, 0  ;;  %v242_v50 = vxor.u32 2147483648, %v241_v44  ;;  %v1433_v61 = vsub.s32 %v322_v27, %v325_v46 }
  0x5e   :  { %vm1732_vm5 = vcmp.lt.s32.totalorder %v1400_v40, 1  ;;  %vm149_vm6 = vcmp.lt.s32.totalorder %v1382_v63, 2  ;;  %vm568_vm7 = vcmp.eq.s32.totalorder %v1384_v1, 2  ;;  %v397_v62 = vor.u32 %v1430_v56, %v1419_v42 }
  0x5f   :  { %v402_v45 = vsel %vm1732_vm5, %v382_v41, %v385_v52  ;;  %vm153_vm8 = vcmp.eq.s32.totalorder %v1382_v63, 2  ;;  %v243_v57 = vsel %vm160_vm10, %v242_v50, %v241_v44  ;;  %v1445_v4 = vand.u32 3, %v247_v21 }
  0x60   :  { %vm916_vm9 = vcmask 1043456   ;;  %v328_v43 = vsub.s32 0, %v1433_v61  ;;  %v246_v6 = vsel %vm1360_vm11, %v1209_v20, %v243_v57  ;;  %v1451_v7 = vand.u32 3, %v251_v48 }
  0x61   :  { %vm401_vm12 = vcmp.lt.s32.totalorder %v1400_v40, 4  ;;  %v406_v29 = vsel %vm1732_vm5, %v385_v52, %v1415_v22  ;;  %vm150_vm10 = vcmp.eq.s32.totalorder %v1382_v63, 0  ;;  %1115 = vcosq.f32 %v246_v6 }
  0x62   :  { %v1063_v16 = vmin.u32 %v328_v43, %v1433_v61  ;;  %1117 = vsinq.f32 %v246_v6  ;;  %vm400_vm11 = vcmp.lt.s32.totalorder %v1400_v40, 3  ;;  %v403_v35 = vsel %vm401_vm12, %v1424_v54, 2102212464 }
  0x63   :  { %v1112_v5 = vpop.eup %1111  ;;  %vm671_vm14 = vcmp.eq.s32.totalorder %v1445_v4, 2  ;;  %v407_v19 = vsel %vm401_vm12, %v1427_v58, 920167782  ;;  %vm254_vm13 = vcmp.eq.s32.totalorder %v1451_v7, 0  ;;  %vm257_vm5 = vcmp.eq.s32.totalorder %v1451_v7, 2 }
  0x64   :  { %v1114_v30 = vpop.eup %1113  ;;  %v154_v12 = vxor.u32 2147483648, %v1112_v5  ;;  %v330_v21 = vclz %v1063_v16  ;;  %v373_v24 = vand.u32 8388607, %v366_v15  ;;  %v404_v63 = vsel %vm400_vm11, %v1415_v22, %v403_v35 }
  0x65   :  { %v151_v18 = vxor.u32 2147483648, %v1114_v30  ;;  %v408_v1 = vsel %vm400_vm11, %v1424_v54, %v407_v19  ;;  %v318_v37 = vadd.s32 %v1378_v60, %v1376_v59  ;;  %v411_v46 = vsel %vm401_vm12, %v397_v62, 1326507024 }
  0x66   :  { %v155_v17 = vsel %vm153_vm8, %v154_v12, %v1114_v30  ;;  %v570_v23 = vsel %vm568_vm7, %v154_v12, %v1114_v30  ;;  %vm668_vm8 = vcmp.eq.s32.totalorder %v1445_v4, 0  ;;  %vm667_vm7 = vcmp.lt.s32.totalorder %v1445_v4, 2 }
  0x67   :  { %v152_v55 = vsel %vm150_vm10, %v1112_v5, %v151_v18  ;;  %v567_v9 = vsel %vm565_vm4, %v1112_v5, %v151_v18  ;;  %v1064_v2 = vadd.s32 4294967294, %v330_v21  ;;  %vm399_vm4 = vcmp.lt.s32.totalorder %v1400_v40, 2 }
  0x68   :  { %v156_v25 = vsel %vm149_vm6, %v152_v55, %v155_v17  ;;  %v571_v26 = vsel %vm564_vm3, %v567_v9, %v570_v23  ;;  %v1507_v41 = vsel %vm399_vm4, %v402_v45, %v404_v63  ;;  %v409_v38 = vsel %vm399_vm4, %v406_v29, %v408_v1 }
  0x69   :  { %v1486_v27 = vsel %vm146_vm15, nan, %v156_v25  ;;  %v1490_v28 = vsel %vm146_vm15, nan, %v571_v26  ;;  %vm1065_vm15 = vcmp.lt.s32.totalorder %v1064_v2, 0  ;;  %v374_v44 = vor.u32 8388608, %v373_v24 }
  0x6a   :  { %v884_v31 = vrot.slane %v1486_v27, 5  ;;  %v890_v32 = vrot.slane %v1490_v28, 2  ;;  %v894_v3 = vrot.slane %v1486_v27, 2  ;;  %v898_v13 = vrot.slane %v1490_v28, 7 }
  0x6b   :  { %v904_v34 = vrot.slane %v1486_v27, 7  ;;  %v333_v47 = vsel %vm1065_vm15, 0, %v1064_v2  ;;  %v1116_v52 = vpop.eup %1115  ;;  %vm1737_vm3 = vcmp.lt.s32.totalorder %v1400_v40, 1  ;;  %vm1738_vm6 = vcmask 1046528  }
  0x6c   :  { %v933_v10 = vsel %vm45_vm0, %v1180_v0, %v884_v31  ;;  %v937_v36 = vsel %vm51_vm2, %v890_v32, %v894_v3  ;;  %v334_v39 = vsub.s32 32, %v333_v47  ;;  %v335_v51 = vshll.u32 %v1433_v61, %v333_v47  ;;  %v1118_v48 = vpop.eup %1117 }
  0x6d   :  { %v935_v59 = vsel %vm48_vm1, %v933_v10, %v890_v32  ;;  %v939_v60 = vsel %vm916_vm9, %v937_v36, %v898_v13  ;;  %v338_v53 = vsub.s32 4294967266, %v333_v47  ;;  %v410_v0 = vsel %vm1737_vm3, %v1415_v22, %v1424_v54 }
  0x6e   :  { %952 = vxpose.xlu0.b32.start [1/4] (short) %v935_v59, 128  ;;  %v258_v50 = vxor.u32 2147483648, %v1116_v52  ;;  %v942_v61 = vsel %vm1738_vm6, %v939_v60, %v904_v34  ;;  %v336_v45 = vshrl.u32 %v318_v37, %v334_v39  ;;  %v412_v57 = vsel %vm400_vm11, %v1427_v58, %v411_v46 }
  0x6f   :  { %vm253_vm10 = vcmp.lt.s32.totalorder %v1451_v7, 2  ;;  %v255_v22 = vxor.u32 2147483648, %v1118_v48  ;;  %v339_v54 = vadd.s32 127, %v338_v53  ;;  %v413_v42 = vsel %vm399_vm4, %v410_v0, %v412_v57 }
  0x70   :  { %vm250_vm12 = vweird.f32 %v1209_v20  ;;  %v259_v56 = vsel %vm257_vm5, %v258_v50, %v1118_v48  ;;  %v673_v62 = vsel %vm671_vm14, %v258_v50, %v1118_v48  ;;  %v337_v43 = vor.u32 %v336_v45, %v335_v51 }
  0x71   :  { %v256_v5 = vsel %vm254_vm13, %v1116_v52, %v255_v22  ;;  %v670_v58 = vsel %vm668_vm8, %v1116_v52, %v255_v22  ;;  %v340_v6 = vshll.u32 %v339_v54, 23  ;;  %v414_v20 = vshll.u32 %v374_v44, 8  ;;  %vm1739_vm13 = vmmov %vm1738_vm6 }
  0x72   :  { %953 = vxpose.xlu0.b32.cont [2/4] (short) %v942_v61, 128  ;;  %v260_v29 = vsel %vm253_vm10, %v256_v5, %v259_v56  ;;  %v674_v40 = vsel %vm667_vm7, %v670_v58, %v673_v62  ;;  %v344_v18 = vcvt.s32.f32 %v337_v43  ;;  %v348_v4 = vsub.s32 4, %v1411_v49 }
  0x73   :  { %v1546_v30 = vsel %vm250_vm12, nan, %v260_v29  ;;  %v1548_v12 = vsel %vm250_vm12, nan, %v674_v40  ;;  %v341_v16 = vor.u32 4788187, %v340_v6  ;;  %vm264_vm5 = vcmp.lt.s32.totalorder %v1200_v14, 0 }
  0x74   :  { %v885_v35 = vrot.slane %v1546_v30, 5  ;;  %v891_v7 = vrot.slane %v1548_v12, 2  ;;  %v895_v17 = vrot.slane %v1546_v30, 2  ;;  %v899_v23 = vrot.slane %v1548_v12, 7 }
  0x75   :  { %v905_v21 = vrot.slane %v1546_v30, 7  ;;  %v342_v19 = vand.u32 2147483647, %v341_v16  ;;  %v1559_v24 = vmul.u32.u64.low %v414_v20, %v413_v42  ;;  %v1560_v25 = vmul.u32.u64.high %v414_v20, %v413_v42, %v1559_v24 }
  0x76   :  { %v934_v55 = vsel %vm45_vm0, %v1189_v8, %v885_v35  ;;  %v938_v9 = vsel %vm51_vm2, %v891_v7, %v895_v17  ;;  %v1565_v1 = vmul.u32.u64.low %v414_v20, %v409_v38  ;;  %v1566_v31 = vmul.u32.u64.high %v414_v20, %v409_v38, %v1565_v1 }
  0x77   :  { %v936_v26 = vsel %vm48_vm1, %v934_v55, %v891_v7  ;;  %v940_v2 = vsel %vm916_vm9, %v938_v9, %v899_v23  ;;  %v345_v63 = vmul.f32 %v344_v18, %v342_v19  ;;  %vm263_vm11 = vcmp.le.f32.partialorder %v262_v11, 0.7853982 }
  0x78   :  { %984 = vxpose.xlu1.b32.start [1/4] (short) %v936_v26, 128  ;;  %v943_v8 = vsel %vm1739_vm13, %v940_v2, %v905_v21  ;;  %v349_v3 = vsel %vm264_vm5, %v348_v4, %v1411_v49  ;;  %v422_v37 = vadd.s32 %v1565_v1, %v1560_v25  ;;  %vm423_vm1 = vc.u32 %v1560_v25, %v1565_v1 }
  0x79   :  { %v346_v32 = vxor.u32 2147483648, %v345_v63  ;;  %v421_v10 = vmul.u32 %v414_v20, %v1507_v41  ;;  %v351_v47 = vsel %vm263_vm11, 0, %v349_v3  ;;  %v424_v38 = vadd.s32 1, %v1566_v31 }
  0x7a   :  { %v355_v59 = vadd.s32 3, %v351_v47  ;;  %v769_v51 = vand.u32 3, %v351_v47  ;;  %vm354_vm6 = vweird.f32 %v1200_v14  ;;  %v917_v42 = vrot.slane %v1490_v28, 4 }
  0x7b   :  { %v347_v13 = vsel %vm264_vm5, %v346_v32, %v345_v63  ;;  %v425_v11 = vsel %vm423_vm1, %v424_v38, %v1566_v31  ;;  %vm944_vm10 = vcmask 1041408   ;;  %vm947_vm12 = vcmask 1044480  }
  0x7c   :  { %985 = vxpose.xlu1.b32.cont [2/4] (short) %v943_v8, 128  ;;  %v350_v36 = vsel %vm263_vm11, %v1200_v14, %v347_v13  ;;  %v426_v60 = vadd.s32 %v425_v11, %v421_v10  ;;  %v356_v39 = vand.u32 3, %v355_v59  ;;  %vm774_vm8 = vcmp.eq.s32.totalorder %v769_v51, 2 }
  0x7d   :  { %1119 = vcosq.f32 %v350_v36  ;;  %vm771_vm4 = vcmp.eq.s32.totalorder %v769_v51, 0  ;;  %vm770_vm3 = vcmp.lt.s32.totalorder %v769_v51, 2  ;;  %vm368_vm13 = vcmp.lt.s32.totalorder %v1303_v33, 0 }
  0x7e   :  { %1121 = vsinq.f32 %v350_v36  ;;  %v427_v49 = vadd.s32 536870912, %v426_v60  ;;  %vm361_vm14 = vcmp.eq.s32.totalorder %v356_v39, 2  ;;  %vm358_vm7 = vcmp.eq.s32.totalorder %v356_v39, 0 }
  0x7f   :  { %vm357_vm15 = vcmp.lt.s32.totalorder %v356_v39, 2  ;;  %vm367_vm11 = vcmp.le.f32.partialorder %v366_v15, 0.7853982  ;;  %v920_v39 = vrot.slane %v1548_v12, 4 }
  0x80   :  { %v428_v52 = vshrl.u32 %v427_v49, 30 }
  0x82   :  { %v429_v53 = vshll.u32 %v428_v52, 30  ;;  %v452_v2 = vsub.s32 4, %v428_v52 }
  0x84   :  { %v430_v41 = vsub.s32 %v426_v60, %v429_v53  ;;  %v453_v31 = vsel %vm368_vm13, %v452_v2, %v428_v52 }
  0x85   :  { %v455_v3 = vsel %vm367_vm11, 0, %v453_v31 }
  0x86   :  { %v432_v50 = vsub.s32 0, %v430_v41  ;;  %v872_v10 = vand.u32 3, %v455_v3 }
  0x87   :  { %v1120_v44 = vpop.eup %1119 }
  0x88   :  { %v1122_v0 = vpop.eup %1121  ;;  %v362_v46 = vxor.u32 2147483648, %v1120_v44  ;;  %v1067_v54 = vmin.u32 %v432_v50, %v430_v41 }
  0x89   :  { %v359_v48 = vxor.u32 2147483648, %v1122_v0 }
  0x8a   :  { %v363_v61 = vsel %vm361_vm14, %v362_v46, %v1122_v0  ;;  %v776_v45 = vsel %vm774_vm8, %v362_v46, %v1122_v0  ;;  %v434_v58 = vclz %v1067_v54  ;;  %vm877_vm14 = vcmp.eq.s32.totalorder %v872_v10, 2 }
  0x8b   :  { %v360_v57 = vsel %vm358_vm7, %v1120_v44, %v359_v48  ;;  %v773_v22 = vsel %vm771_vm4, %v1120_v44, %v359_v48  ;;  %vm874_vm7 = vcmp.eq.s32.totalorder %v872_v10, 0 }
  0x8c   :  { %v364_v56 = vsel %vm357_vm15, %v360_v57, %v363_v61  ;;  %v777_v62 = vsel %vm770_vm3, %v773_v22, %v776_v45  ;;  %v1068_v20 = vadd.s32 4294967294, %v434_v58  ;;  %vm873_vm15 = vcmp.lt.s32.totalorder %v872_v10, 2 }
  0x8d   :  { %v365_v43 = vsel %vm354_vm6, nan, %v364_v56  ;;  %v778_v5 = vsel %vm354_vm6, nan, %v777_v62  ;;  %vm458_vm3 = vweird.f32 %v1303_v33  ;;  %vm1016_vm6 = vcmask 220160  }
  0x8e   :  { %v906_v6 = vrot.slane %v365_v43, 7  ;;  %v918_v29 = vrot.slane %v778_v5, 4  ;;  %v925_v40 = vrot.slane %v365_v43, 4  ;;  %v929_v18 = vrot.slane %v778_v5, 1 }
  0x8f   :  { %vm1069_vm5 = vcmp.lt.s32.totalorder %v1068_v20, 0 }
  0x90   :  { %v907_v14 = vsel %vm51_vm2, %v904_v34, %v906_v6  ;;  %v919_v16 = vsel %vm916_vm9, %v917_v42, %v918_v29  ;;  %v437_v7 = vsel %vm1069_vm5, 0, %v1068_v20  ;;  %v950_v4 = vsel %vm45_vm0, %v929_v18, 0.0 }
  0x91   :  { %v945_v28 = vsel %vm944_vm10, %v907_v14, %v919_v16  ;;  %v438_v17 = vsub.s32 32, %v437_v7  ;;  %v439_v23 = vshll.u32 %v430_v41, %v437_v7  ;;  %v442_v19 = vsub.s32 4294967266, %v437_v7 }
  0x92   :  { %v948_v35 = vsel %vm947_vm12, %v945_v28, %v925_v40 }
  0x93   :  { %954 = vxpose.xlu0.b32.cont [3/4] (short) %v948_v35, 128  ;;  %v440_v55 = vshrl.u32 %v422_v37, %v438_v17  ;;  %v443_v9 = vadd.s32 127, %v442_v19  ;;  %v459_v37 = vadd.s32 3, %v455_v3 }
  0x95   :  { %v441_v27 = vor.u32 %v440_v55, %v439_v23  ;;  %v444_v24 = vshll.u32 %v443_v9, 23  ;;  %v460_v13 = vand.u32 3, %v459_v37 }
  0x97   :  { %955 = vxpose.xlu0.b32.end [4/4] (short) %v950_v4, 128  ;;  %v445_v34 = vor.u32 4788187, %v444_v24  ;;  %v448_v25 = vcvt.s32.f32 %v441_v27  ;;  %vm465_vm1 = vcmp.eq.s32.totalorder %v460_v13, 2  ;;  %vm462_vm8 = vcmp.eq.s32.totalorder %v460_v13, 0 }
  0x98   :  { %vm461_vm4 = vcmp.lt.s32.totalorder %v460_v13, 2 }
  0x99   :  { %v446_v26 = vand.u32 2147483647, %v445_v34 }
  0x9b   :  { %v449_v63 = vmul.f32 %v448_v25, %v446_v26 }
  0x9d   :  { %v450_v1 = vxor.u32 2147483648, %v449_v63 }
  0x9f   :  { %v451_v8 = vsel %vm368_vm13, %v450_v1, %v449_v63 }
  0xa0   :  { %v454_v32 = vsel %vm367_vm11, %v1303_v33, %v451_v8 }
  0xa1   :  { %1123 = vcosq.f32 %v454_v32 }
  0xa2   :  { %1125 = vsinq.f32 %v454_v32 }
  0xab   :  { %v1124_v36 = vpop.eup %1123 }
  0xac   :  { %v1126_v47 = vpop.eup %1125  ;;  %v466_v38 = vxor.u32 2147483648, %v1124_v36 }
  0xad   :  { %v463_v15 = vxor.u32 2147483648, %v1126_v47 }
  0xae   :  { %v467_v11 = vsel %vm465_vm1, %v466_v38, %v1126_v47  ;;  %v879_v59 = vsel %vm877_vm14, %v466_v38, %v1126_v47 }
  0xaf   :  { %v464_v60 = vsel %vm462_vm8, %v1124_v36, %v463_v15  ;;  %v876_v49 = vsel %vm874_vm7, %v1124_v36, %v463_v15 }
  0xb0   :  { %v468_v51 = vsel %vm461_vm4, %v464_v60, %v467_v11  ;;  %v880_v52 = vsel %vm873_vm15, %v876_v49, %v879_v59 }
  0xb1   :  { %v469_v53 = vsel %vm458_vm3, nan, %v468_v51  ;;  %v881_v44 = vsel %vm458_vm3, nan, %v880_v52 }
  0xb2   :  { %v908_v41 = vrot.slane %v469_v53, 7  ;;  %v921_v0 = vrot.slane %v881_v44, 4  ;;  %v926_v46 = vrot.slane %v469_v53, 4  ;;  %v930_v33 = vrot.slane %v881_v44, 1 }
  0xb4   :  { %v909_v48 = vsel %vm51_vm2, %v905_v21, %v908_v41  ;;  %v922_v50 = vsel %vm916_vm9, %v920_v39, %v921_v0  ;;  %v951_v12 = vsel %vm45_vm0, %v930_v33, 0.0 }
  0xb5   :  { %v946_v61 = vsel %vm944_vm10, %v909_v48, %v922_v50 }
  0xb6   :  { %v949_v45 = vsel %vm947_vm12, %v946_v61, %v926_v46 }
  0xb7   :  { %986 = vxpose.xlu1.b32.cont [3/4] (short) %v949_v45, 128 }
  0xbb   :  { %987 = vxpose.xlu1.b32.end [4/4] (short) %v951_v12, 128 }
 0x10b   :  { %v968_v57 = vpop.trf.xlu0 }
 0x10c   :  { %1017 = vst.msk [vmem:[%s1731_s1] sm:$0xff] %vm1016_vm6, %v968_v57 }
 0x10f   :  { %v969_v30 = vpop.trf.xlu0 }
 0x110   :  { %1018 = vst.msk [vmem:[%s1731_s1 + $0x8] sm:$0xff] %vm1016_vm6, %v969_v30 }
 0x113   :  { %v970_v21 = vpop.trf.xlu0 }
 0x114   :  { %1019 = vst.msk [vmem:[%s1731_s1 + $0x10] sm:$0xff] %vm1016_vm6, %v970_v21 }
 0x117   :  { %v971_v22 = vpop.trf.xlu0 }
 0x118   :  { %1020 = vst.msk [vmem:[%s1731_s1 + $0x18] sm:$0xff] %vm1016_vm6, %v971_v22 }
 0x11b   :  { %v972_v54 = vpop.trf.xlu0 }
 0x11c   :  { %1021 = vst.msk [vmem:[%s1731_s1 + $0x20] sm:$0xff] %vm1016_vm6, %v972_v54 }
 0x11f   :  { %v973_v42 = vpop.trf.xlu0 }
 0x120   :  { %1022 = vst.msk [vmem:[%s1731_s1 + $0x28] sm:$0xff] %vm1016_vm6, %v973_v42 }
 0x123   :  { %v974_v56 = vpop.trf.xlu0 }
 0x124   :  { %1023 = vst.msk [vmem:[%s1731_s1 + $0x30] sm:$0xff] %vm1016_vm6, %v974_v56 }
 0x127   :  { %v975_v62 = vpop.trf.xlu0 }
 0x128   :  { %1024 = vst.msk [vmem:[%s1731_s1 + $0x38] sm:$0xff] %vm1016_vm6, %v975_v62 }
 0x12b   :  { %v976_v43 = vpop.trf.xlu0 }
 0x12c   :  { %1025 = vst.msk [vmem:[%s1731_s1 + $0x40] sm:$0xff] %vm1016_vm6, %v976_v43 }
 0x12f   :  { %v977_v5 = vpop.trf.xlu0  ;;  %v1000_v58 = vpop.trf.xlu1 }
 0x130   :  { %1026 = vst.msk [vmem:[%s1731_s1 + $0x48] sm:$0xff] %vm1016_vm6, %v977_v5  ;;  %1033 = vst.msk [vmem:[%s1731_s1 + $0x80] sm:$0xff] %vm1016_vm6, %v1000_v58 }
 0x133   :  { %v978_v6 = vpop.trf.xlu0  ;;  %v1001_v29 = vpop.trf.xlu1 }
 0x134   :  { %1027 = vst.msk [vmem:[%s1731_s1 + $0x50] sm:$0xff] %vm1016_vm6, %v978_v6  ;;  %1034 = vst.msk [vmem:[%s1731_s1 + $0x88] sm:$0xff] %vm1016_vm6, %v1001_v29 }
 0x137   :  { %v979_v40 = vpop.trf.xlu0  ;;  %v1002_v20 = vpop.trf.xlu1 }
 0x138   :  { %1028 = vst.msk [vmem:[%s1731_s1 + $0x58] sm:$0xff] %vm1016_vm6, %v979_v40  ;;  %1035 = vst.msk [vmem:[%s1731_s1 + $0x90] sm:$0xff] %vm1016_vm6, %v1002_v20 }
 0x13b   :  { %v980_v14 = vpop.trf.xlu0  ;;  %v1003_v16 = vpop.trf.xlu1 }
 0x13c   :  { %1029 = vst.msk [vmem:[%s1731_s1 + $0x60] sm:$0xff] %vm1016_vm6, %v980_v14  ;;  %1036 = vst.msk [vmem:[%s1731_s1 + $0x98] sm:$0xff] %vm1016_vm6, %v1003_v16 }
 0x13f   :  { %v981_v18 = vpop.trf.xlu0  ;;  %v1004_v28 = vpop.trf.xlu1 }
 0x140   :  { %1030 = vst.msk [vmem:[%s1731_s1 + $0x68] sm:$0xff] %vm1016_vm6, %v981_v18  ;;  %1037 = vst.msk [vmem:[%s1731_s1 + $0xa0] sm:$0xff] %vm1016_vm6, %v1004_v28 }
 0x143   :  { %v982_v35 = vpop.trf.xlu0  ;;  %v1005_v7 = vpop.trf.xlu1 }
 0x144   :  { %1031 = vst.msk [vmem:[%s1731_s1 + $0x70] sm:$0xff] %vm1016_vm6, %v982_v35  ;;  %1038 = vst.msk [vmem:[%s1731_s1 + $0xa8] sm:$0xff] %vm1016_vm6, %v1005_v7 }
 0x147   :  { %v983_v17 = vpop.trf.xlu0  ;;  %v1006_v23 = vpop.trf.xlu1 }
 0x148   :  { %1032 = vst.msk [vmem:[%s1731_s1 + $0x78] sm:$0xff] %vm1016_vm6, %v983_v17  ;;  %1039 = vst.msk [vmem:[%s1731_s1 + $0xb0] sm:$0xff] %vm1016_vm6, %v1006_v23 }
 0x14b   :  { %v1007_v19 = vpop.trf.xlu1 }
 0x14c   :  { %1040 = vst.msk [vmem:[%s1731_s1 + $0xb8] sm:$0xff] %vm1016_vm6, %v1007_v19 }
 0x14f   :  { %v1008_v4 = vpop.trf.xlu1 }
 0x150   :  { %1041 = vst.msk [vmem:[%s1731_s1 + $0xc0] sm:$0xff] %vm1016_vm6, %v1008_v4 }
 0x153   :  { %v1009_v55 = vpop.trf.xlu1 }
 0x154   :  { %1042 = vst.msk [vmem:[%s1731_s1 + $0xc8] sm:$0xff] %vm1016_vm6, %v1009_v55 }
 0x157   :  { %v1010_v9 = vpop.trf.xlu1 }
 0x158   :  { %1043 = vst.msk [vmem:[%s1731_s1 + $0xd0] sm:$0xff] %vm1016_vm6, %v1010_v9 }
 0x15b   :  { %v1011_v27 = vpop.trf.xlu1 }
 0x15c   :  { %1044 = vst.msk [vmem:[%s1731_s1 + $0xd8] sm:$0xff] %vm1016_vm6, %v1011_v27 }
 0x15f   :  { %v1012_v24 = vpop.trf.xlu1 }
 0x160   :  { %1045 = vst.msk [vmem:[%s1731_s1 + $0xe0] sm:$0xff] %vm1016_vm6, %v1012_v24 }
 0x163   :  { %v1013_v34 = vpop.trf.xlu1 }
 0x164   :  { %1046 = vst.msk [vmem:[%s1731_s1 + $0xe8] sm:$0xff] %vm1016_vm6, %v1013_v34 }
 0x167   :  { %v1014_v25 = vpop.trf.xlu1 }
 0x168   :  { %1047 = vst.msk [vmem:[%s1731_s1 + $0xf0] sm:$0xff] %vm1016_vm6, %v1014_v25 }
 0x16b   :  { %v1015_v26 = vpop.trf.xlu1 }
 0x16c   :  { %1048 = vst.msk [vmem:[%s1731_s1 + $0xf8] sm:$0xff] %vm1016_vm6, %v1015_v26 }
 0x16d   :  { %1053 = vsyncpa [#allocation3], 1 }

// kernel: tpu_custom_call.1
= control target key start
LH: loop header
LB: loop body
LE: loop exit
PB: predicated region body
PF: predicated region fallthrough
CT: control target
= control target key end

     0   :  { %6 = vsyncpa [#allocation3], 0  ;;  %s1441_s0 = inlined_call_operand.hbm [shape: f32[3,256], index: 0, kind: input, shape index: {}]   ;;  %s1442_s1 = inlined_call_operand.hbm [shape: f32[27,256], index: 1, kind: output, shape index: {}]  }
   0x1   :  { %7 = vsyncpa [#allocation4], 0  ;;  %s1060_s6 = smov [#allocation2]   ;;  %s1012_s10 = scalar_lea.hbm %s1441_s0, 128 }
   0x2   :  { %s14_s7 = sshll.u32 %s1060_s6, 4  ;;  %p1013_p0 = scmp.ne.s32.totalorder %s1441_s0, %s1012_s10  ;;  %s15_s7 = int_to_ptr.vmem [resolvable:$true] %s14_s7 }
   0x3   :  { %p1016_p1 = scmp.lt.u32.totalorder %s1012_s10, %s1441_s0 }
   0x5   :  { %p1018_p2 = pnand %p1016_p1, %p1013_p0 }
   0x7   :  { %1021 = shalt.err (!%p1018_p2)
}
   0x8   :  { %s1022_s15 = scalar_lea.vmem %s15_s7, 128  ;;  %p1027_p4 = scmp.lt.s32.totalorder %s15_s7, %s15_s7 }
   0x9   :  { %p1023_p3 = scmp.ne.s32.totalorder %s15_s7, %s1022_s15  ;;  %p1028_p5 = scmp.lt.s32.totalorder %s1022_s15, %s1022_s15 }
   0xb   :  { %p1029_p6 = por %p1028_p5, %p1027_p4 }
   0xd   :  { %p1030_p7 = pnand %p1029_p6, %p1023_p3 }
   0xf   :  { %1033 = shalt.err (!%p1030_p7)
}
  0x10   :  { %17 = dma.hbm_to_vmem [thread:$0]  %s1441_s0, 128, %s15_s7, [#allocation3]  }
  0x11   :  { %1056 = dma.done.wait [#allocation3], 128  }
  0x12   :  { %1057 = vsyncadd [#allocation3], 4294967168  ;;  %v1092_v0 = vld [vmem:[#allocation2] sm:$0x77]  ;;  %v1061_v27 = vmov 683565275  }
  0x13   :  { %25 = vst [vmem:[#allocation5] sm:$0x7] %v1092_v0  ;;  %v23_v1 = vcombine.high %v1092_v0, %v1092_v0  ;;  %v27_v2 = vand.u32 2147483647, %v1092_v0  ;;  %v30_v3 = vand.u32 2139095040, %v1092_v0  ;;  %v1100_v4 = vmul.f32 2.0, %v1092_v0 }
  0x14   :  { %v1103_v5 = vmul.f32 4.0, %v1092_v0  ;;  %v1062_v29 = vmov 2475754826   ;;  %v1063_v31 = vmov 2131351028   ;;  %vm29_vm13 = vcmp.lt.s32.totalorder %v1092_v0, 0 }
  0x15   :  { %26 = vst [vmem:[#allocation5 + $0x8] sm:$0x7] %v23_v1  ;;  %v31_v6 = vshrl.u32 %v30_v3, 23  ;;  %v34_v7 = vand.u32 8388607, %v27_v2  ;;  %v256_v9 = vand.u32 2139095040, %v1100_v4 }
  0x16   :  { %v253_v8 = vand.u32 2147483647, %v1100_v4  ;;  %v477_v13 = vand.u32 2139095040, %v1103_v5  ;;  %v1064_v33 = vmov 2102212464   ;;  %s1067_s0 = smov [#allocation5]  }
  0x17   :  { %v937_v10 = vadd.s32 4294967169, %v31_v6  ;;  %v257_v11 = vshrl.u32 %v256_v9, 23  ;;  %v35_v15 = vor.u32 8388608, %v34_v7  ;;  %v1065_v35 = vmov 920167782   ;;  %s925_s18 = sshll.u32 %s1067_s0, 4  ;;  %s926_s18 = int_to_ptr.vmem [resolvable:$true] %s925_s18 }
  0x18   :  { %v260_v12 = vand.u32 8388607, %v253_v8  ;;  %v478_v18 = vshrl.u32 %v477_v13, 23  ;;  %v1066_v42 = vmov 1326507024   ;;  %s1034_s19 = scalar_lea.vmem %s926_s18, 1024  ;;  %p1039_p9 = scmp.lt.s32.totalorder %s926_s18, %s926_s18 }
  0x19   :  { %v37_v14 = vadd.s32 1, %v937_v10  ;;  %v945_v16 = vadd.s32 4294967169, %v257_v11  ;;  %v1112_v23 = vshll.u32 %v35_v15, 8  ;;  %vm1208_vm14 = vcmp.le.f32.partialorder %v27_v2, 0.7853982  ;;  %p1035_p8 = scmp.ne.s32.totalorder %s926_s18, %s1034_s19  ;;  %p1040_p10 = scmp.lt.s32.totalorder %s1034_s19, %s1034_s19 }
  0x1a   :  { %v261_v17 = vor.u32 8388608, %v260_v12  ;;  %v1116_v25 = vadd.s32 4294967169, %v478_v18 }
  0x1b   :  { %vm38_vm0 = vcmp.gt.s32.totalorder %v37_v14, 0  ;;  %v263_v20 = vadd.s32 1, %v945_v16  ;;  %p1041_p11 = por %p1040_p10, %p1039_p9 }
  0x1c   :  { %v39_v19 = vsel %vm38_vm0, %v37_v14, 0  ;;  %v1114_v24 = vshll.u32 %v261_v17, 8  ;;  %vm255_vm0 = vcmp.lt.s32.totalorder %v1100_v4, 0 }
  0x1d   :  { %v40_v21 = vshrl.u32 %v39_v19, 5  ;;  %v41_v22 = vand.u32 31, %v39_v19  ;;  %vm264_vm1 = vcmp.gt.s32.totalorder %v263_v20, 0  ;;  %p1042_p12 = pnand %p1041_p11, %p1035_p8 }
  0x1e   :  { %v265_v47 = vsel %vm264_vm1, %v263_v20, 0 }
  0x1f   :  { %v42_v26 = vsub.s32 32, %v41_v22  ;;  %v44_v28 = vshll.u32 %v1061_v27, %v41_v22  ;;  %v47_v30 = vshll.u32 %v1062_v29, %v41_v22  ;;  %v50_v32 = vshll.u32 %v1063_v31, %v41_v22 }
  0x20   :  { %v53_v34 = vshll.u32 %v1064_v33, %v41_v22  ;;  %v56_v36 = vshll.u32 %v1065_v35, %v41_v22  ;;  %vm59_vm2 = vcmp.lt.s32.totalorder %v40_v21, 1  ;;  %vm60_vm3 = vcmp.lt.s32.totalorder %v40_v21, 2 }
  0x21   :  { %v43_v37 = vshrl.u32 %v1061_v27, %v42_v26  ;;  %v45_v38 = vshrl.u32 %v1062_v29, %v42_v26  ;;  %v48_v39 = vshrl.u32 %v1063_v31, %v42_v26  ;;  %v51_v40 = vshrl.u32 %v1064_v33, %v42_v26 }
  0x22   :  { %v54_v41 = vshrl.u32 %v1065_v35, %v42_v26  ;;  %v57_v43 = vshrl.u32 %v1066_v42, %v42_v26  ;;  %vm61_vm4 = vcmp.lt.s32.totalorder %v40_v21, 3  ;;  %vm62_vm5 = vcmp.lt.s32.totalorder %v40_v21, 4 }
  0x23   :  { %v46_v44 = vor.u32 %v45_v38, %v44_v28  ;;  %v49_v45 = vor.u32 %v48_v39, %v47_v30  ;;  %v52_v46 = vor.u32 %v51_v40, %v50_v32  ;;  %v266_v50 = vshrl.u32 %v265_v47, 5 }
  0x24   :  { %v55_v48 = vor.u32 %v54_v41, %v53_v34  ;;  %v58_v49 = vor.u32 %v57_v43, %v56_v36  ;;  %v267_v51 = vand.u32 31, %v265_v47  ;;  %v484_v30 = vadd.s32 1, %v1116_v25 }
  0x25   :  { %v63_v52 = vsel %vm59_vm2, %v43_v37, %v46_v44  ;;  %v64_v53 = vsel %vm62_vm5, %v52_v46, 2102212464  ;;  %v67_v54 = vsel %vm59_vm2, %v46_v44, %v49_v45  ;;  %v71_v55 = vsel %vm59_vm2, %v49_v45, %v52_v46 }
  0x26   :  { %v65_v56 = vsel %vm61_vm4, %v49_v45, %v64_v53  ;;  %v68_v57 = vsel %vm62_vm5, %v55_v48, 920167782  ;;  %v72_v58 = vsel %vm62_vm5, %v58_v49, 1326507024  ;;  %v268_v59 = vsub.s32 32, %v267_v51 }
  0x27   :  { %v66_v60 = vsel %vm60_vm3, %v63_v52, %v65_v56  ;;  %v69_v61 = vsel %vm61_vm4, %v52_v46, %v68_v57  ;;  %v73_v62 = vsel %vm61_vm4, %v55_v48, %v72_v58  ;;  %v270_v63 = vshll.u32 %v1061_v27, %v267_v51 }
  0x28   :  { %v70_v1 = vsel %vm60_vm3, %v67_v54, %v69_v61  ;;  %v74_v3 = vsel %vm60_vm3, %v71_v55, %v73_v62  ;;  %v82_v6 = vmul.u32 %v1112_v23, %v66_v60  ;;  %v269_v7 = vshrl.u32 %v1061_v27, %v268_v59 }
  0x29   :  { %v1143_v9 = vmul.u32.u64.low %v1112_v23, %v74_v3  ;;  %v1144_v10 = vmul.u32.u64.high %v1112_v23, %v74_v3, %v1143_v9  ;;  %v1147_v11 = vmul.u32.u64.low %v1112_v23, %v70_v1  ;;  %v1148_v12 = vmul.u32.u64.high %v1112_v23, %v70_v1, %v1147_v11 }
  0x2a   :  { %v271_v13 = vshrl.u32 %v1062_v29, %v268_v59  ;;  %v273_v14 = vshll.u32 %v1062_v29, %v267_v51  ;;  %v274_v15 = vshrl.u32 %v1063_v31, %v268_v59  ;;  %v276_v16 = vshll.u32 %v1063_v31, %v267_v51 }
  0x2b   :  { %v277_v17 = vshrl.u32 %v1064_v33, %v268_v59  ;;  %v279_v18 = vshll.u32 %v1064_v33, %v267_v51  ;;  %v280_v19 = vshrl.u32 %v1065_v35, %v268_v59  ;;  %v282_v20 = vshll.u32 %v1065_v35, %v267_v51 }
  0x2c   :  { %v272_v21 = vor.u32 %v271_v13, %v270_v63  ;;  %v275_v22 = vor.u32 %v274_v15, %v273_v14  ;;  %v283_v23 = vshrl.u32 %v1066_v42, %v268_v59  ;;  %vm285_vm6 = vcmp.lt.s32.totalorder %v266_v50, 1 }
  0x2d   :  { %vm84_vm7 = vc.u32 %v1144_v10, %v1147_v11  ;;  %v85_v26 = vadd.s32 1, %v1148_v12  ;;  %v278_v28 = vor.u32 %v277_v17, %v276_v16  ;;  %v281_v32 = vor.u32 %v280_v19, %v279_v18 }
  0x2e   :  { %v284_v34 = vor.u32 %v283_v23, %v282_v20  ;;  %vm286_vm8 = vcmp.lt.s32.totalorder %v266_v50, 2  ;;  %vm287_vm9 = vcmp.lt.s32.totalorder %v266_v50, 3  ;;  %vm288_vm10 = vcmp.lt.s32.totalorder %v266_v50, 4 }
  0x2f   :  { %v86_v36 = vsel %vm84_vm7, %v85_v26, %v1148_v12  ;;  %v289_v37 = vsel %vm285_vm6, %v269_v7, %v272_v21  ;;  %v293_v38 = vsel %vm285_vm6, %v272_v21, %v275_v22  ;;  %v290_v40 = vsel %vm288_vm10, %v278_v28, 2102212464 }
  0x30   :  { %v87_v39 = vadd.s32 %v86_v36, %v82_v6  ;;  %v294_v41 = vsel %vm288_vm10, %v281_v32, 920167782  ;;  %v297_v43 = vsel %vm285_vm6, %v275_v22, %v278_v28  ;;  %v291_v44 = vsel %vm287_vm9, %v275_v22, %v290_v40 }
  0x31   :  { %v295_v45 = vsel %vm287_vm9, %v278_v28, %v294_v41  ;;  %v298_v46 = vsel %vm288_vm10, %v284_v34, 1326507024  ;;  %vm485_vm11 = vcmp.gt.s32.totalorder %v484_v30, 0  ;;  %v474_v49 = vand.u32 2147483647, %v1103_v5 }
  0x32   :  { %v88_v25 = vadd.s32 536870912, %v87_v39  ;;  %v296_v47 = vsel %vm286_vm8, %v293_v38, %v295_v45  ;;  %v299_v48 = vsel %vm287_vm9, %v281_v32, %v298_v46  ;;  %v292_v51 = vsel %vm286_vm8, %v289_v37, %v291_v44 }
  0x33   :  { %v300_v52 = vsel %vm286_vm8, %v297_v43, %v299_v48  ;;  %v1173_v53 = vmul.u32.u64.low %v1114_v24, %v296_v47  ;;  %v1174_v54 = vmul.u32.u64.high %v1114_v24, %v296_v47, %v1173_v53  ;;  %v486_v58 = vsel %vm485_vm11, %v484_v30, 0 }
  0x34   :  { %v89_v55 = vshrl.u32 %v88_v25, 30  ;;  %v1177_v56 = vmul.u32.u64.low %v1114_v24, %v300_v52  ;;  %v1178_v57 = vmul.u32.u64.high %v1114_v24, %v300_v52, %v1177_v56  ;;  %v488_v59 = vand.u32 31, %v486_v58 }
  0x35   :  { %v308_v61 = vmul.u32 %v1114_v24, %v292_v51  ;;  %v311_v62 = vadd.s32 1, %v1174_v54  ;;  %v481_v50 = vand.u32 8388607, %v474_v49  ;;  %v1186_v1 = vmul.f32 8.0, %v1092_v0 }
  0x36   :  { %v90_v60 = vshll.u32 %v89_v55, 30  ;;  %vm310_vm12 = vc.u32 %v1178_v57, %v1173_v53  ;;  %v489_v6 = vsub.s32 32, %v488_v59  ;;  %v113_v14 = vsub.s32 4, %v89_v55 }
  0x37   :  { %v312_v3 = vsel %vm310_vm12, %v311_v62, %v1174_v54  ;;  %v482_v12 = vor.u32 8388608, %v481_v50  ;;  %v700_v13 = vand.u32 2147483647, %v1186_v1  ;;  %v703_v15 = vand.u32 2139095040, %v1186_v1 }
  0x38   :  { %v91_v63 = vsub.s32 %v87_v39, %v90_v60  ;;  %v313_v9 = vadd.s32 %v312_v3, %v308_v61  ;;  %v491_v17 = vshll.u32 %v1061_v27, %v488_v59  ;;  %v492_v18 = vshrl.u32 %v1062_v29, %v489_v6 }
  0x39   :  { %v494_v19 = vshll.u32 %v1062_v29, %v488_v59  ;;  %v495_v21 = vshrl.u32 %v1063_v31, %v489_v6  ;;  %v497_v22 = vshll.u32 %v1063_v31, %v488_v59  ;;  %v498_v23 = vshrl.u32 %v1064_v33, %v489_v6 }
  0x3a   :  { %v93_v7 = vsub.s32 0, %v91_v63  ;;  %v314_v16 = vadd.s32 536870912, %v313_v9  ;;  %v83_v26 = vadd.s32 %v1147_v11, %v1144_v10  ;;  %v1200_v30 = vshll.u32 %v482_v12, 8 }
  0x3b   :  { %v1204_v32 = vand.u32 8388607, %v700_v13  ;;  %v487_v37 = vshrl.u32 %v486_v58, 5  ;;  %v500_v38 = vshll.u32 %v1064_v33, %v488_v59  ;;  %v501_v39 = vshrl.u32 %v1065_v35, %v489_v6 }
  0x3c   :  { %v938_v24 = vmin.u32 %v93_v7, %v91_v63  ;;  %v315_v28 = vshrl.u32 %v314_v16, 30  ;;  %v114_v10 = vsel %vm29_vm13, %v113_v14, %v89_v55  ;;  %v1217_v11 = vadd.s32 %v1173_v53, %v1178_v57 }
  0x3d   :  { %v704_v41 = vshrl.u32 %v703_v15, 23  ;;  %v493_v2 = vor.u32 %v492_v18, %v491_v17  ;;  %v496_v43 = vor.u32 %v495_v21, %v494_v19  ;;  %v499_v44 = vor.u32 %v498_v23, %v497_v22 }
  0x3e   :  { %v95_v20 = vclz %v938_v24  ;;  %v316_v40 = vshll.u32 %v315_v28, 30  ;;  %v503_v25 = vshll.u32 %v1065_v35, %v488_v59  ;;  %v504_v47 = vshrl.u32 %v1066_v42, %v489_v6 }
  0x3f   :  { %v502_v53 = vor.u32 %v501_v39, %v500_v38  ;;  %v490_v55 = vshrl.u32 %v1061_v27, %v489_v6  ;;  %vm506_vm1 = vcmp.lt.s32.totalorder %v487_v37, 1  ;;  %vm509_vm2 = vcmp.lt.s32.totalorder %v487_v37, 4 }
  0x40   :  { %v939_v36 = vadd.s32 4294967294, %v95_v20  ;;  %v1220_v46 = vsub.s32 %v313_v9, %v316_v40  ;;  %vm507_vm3 = vcmp.lt.s32.totalorder %v487_v37, 2  ;;  %v511_v58 = vsel %vm509_vm2, %v499_v44, 2102212464 }
  0x41   :  { %v339_v59 = vsub.s32 4, %v315_v28  ;;  %v505_v61 = vor.u32 %v504_v47, %v503_v25  ;;  %vm508_vm4 = vcmp.lt.s32.totalorder %v487_v37, 3  ;;  %v515_v3 = vsel %vm509_vm2, %v502_v53, 920167782 }
  0x42   :  { %vm940_vm15 = vcmp.lt.s32.totalorder %v939_v36, 0  ;;  %v319_v54 = vsub.s32 0, %v1220_v46  ;;  %v116_v6 = vsel %vm1208_vm14, 0, %v114_v10  ;;  %vm1234_vm5 = vcmp.le.f32.partialorder %v253_v8, 0.7853982 }
  0x43   :  { %v98_v45 = vsel %vm940_vm15, 0, %v939_v36  ;;  %v510_v12 = vsel %vm506_vm1, %v490_v55, %v493_v2  ;;  %v512_v24 = vsel %vm508_vm4, %v496_v43, %v511_v58  ;;  %v516_v16 = vsel %vm508_vm4, %v499_v44, %v515_v3 }
  0x44   :  { %v99_v48 = vsub.s32 32, %v98_v45  ;;  %v100_v51 = vshll.u32 %v91_v63, %v98_v45  ;;  %v103_v52 = vsub.s32 4294967266, %v98_v45  ;;  %v946_v60 = vmin.u32 %v319_v54, %v1220_v46 }
  0x45   :  { %v514_v63 = vsel %vm506_vm1, %v493_v2, %v496_v43  ;;  %v518_v17 = vsel %vm506_vm1, %v496_v43, %v499_v44  ;;  %v340_v19 = vsel %vm255_vm0, %v339_v59, %v315_v28  ;;  %v519_v20 = vsel %vm509_vm2, %v505_v61, 1326507024 }
  0x46   :  { %v101_v56 = vshrl.u32 %v83_v26, %v99_v48  ;;  %v104_v57 = vadd.s32 127, %v103_v52  ;;  %v321_v9 = vclz %v946_v60  ;;  %v517_v8 = vsel %vm507_vm3, %v514_v63, %v516_v16 }
  0x47   :  { %v520_v22 = vsel %vm508_vm4, %v502_v53, %v519_v20  ;;  %v1248_v23 = vmul.u32.u64.low %v1200_v30, %v517_v8  ;;  %v1249_v26 = vmul.u32.u64.high %v1200_v30, %v517_v8, %v1248_v23  ;;  %v513_v36 = vsel %vm507_vm3, %v510_v12, %v512_v24 }
  0x48   :  { %v102_v62 = vor.u32 %v101_v56, %v100_v51  ;;  %v105_v50 = vshll.u32 %v104_v57, 23  ;;  %v947_v18 = vadd.s32 4294967294, %v321_v9  ;;  %v521_v38 = vsel %vm507_vm3, %v518_v17, %v520_v22 }
  0x49   :  { %v961_v39 = vadd.s32 4294967169, %v704_v41  ;;  %v1255_v40 = vmul.u32.u64.low %v1200_v30, %v521_v38  ;;  %v1256_v2 = vmul.u32.u64.high %v1200_v30, %v521_v38, %v1255_v40  ;;  %v120_v48 = vadd.s32 3, %v116_v6 }
  0x4a   :  { %v106_v14 = vor.u32 4788187, %v105_v50  ;;  %v109_v15 = vcvt.s32.f32 %v102_v62  ;;  %vm948_vm6 = vcmp.lt.s32.totalorder %v947_v18, 0  ;;  %v529_v51 = vmul.u32 %v1200_v30, %v513_v36 }
  0x4b   :  { %v324_v28 = vsel %vm948_vm6, 0, %v947_v18  ;;  %v710_v25 = vadd.s32 1, %v961_v39  ;;  %v532_v52 = vadd.s32 1, %v1249_v26  ;;  %v1261_v37 = vand.u32 3, %v116_v6 }
  0x4c   :  { %v107_v21 = vand.u32 2147483647, %v106_v14  ;;  %v325_v43 = vsub.s32 32, %v324_v28  ;;  %v326_v44 = vshll.u32 %v1220_v46, %v324_v28  ;;  %v329_v45 = vsub.s32 4294967266, %v324_v28 }
  0x4d   :  { %vm711_vm7 = vcmp.gt.s32.totalorder %v710_v25, 0  ;;  %v342_v46 = vsel %vm1234_vm5, 0, %v340_v19  ;;  %vm531_vm8 = vc.u32 %v1256_v2, %v1248_v23  ;;  %v1274_v58 = vand.u32 3, %v120_v48 }
  0x4e   :  { %v110_v10 = vmul.f32 %v109_v15, %v107_v21  ;;  %v327_v41 = vshrl.u32 %v1217_v11, %v325_v43  ;;  %v330_v53 = vadd.s32 127, %v329_v45  ;;  %v712_v55 = vsel %vm711_vm7, %v710_v25, 0 }
  0x4f   :  { %v533_v11 = vsel %vm531_vm8, %v532_v52, %v1249_v26  ;;  %v714_v59 = vand.u32 31, %v712_v55  ;;  %v346_v50 = vadd.s32 3, %v342_v46  ;;  %v1285_v16 = vshrl.u32 %v712_v55, 5 }
  0x50   :  { %v111_v47 = vxor.u32 2147483648, %v110_v10  ;;  %v328_v56 = vor.u32 %v327_v41, %v326_v44  ;;  %v331_v57 = vshll.u32 %v330_v53, 23  ;;  %v534_v60 = vadd.s32 %v533_v11, %v529_v51 }
  0x51   :  { %v715_v3 = vsub.s32 32, %v714_v59  ;;  %v717_v6 = vshll.u32 %v1061_v27, %v714_v59  ;;  %v720_v34 = vshll.u32 %v1062_v29, %v714_v59  ;;  %v723_v12 = vshll.u32 %v1063_v31, %v714_v59 }
  0x52   :  { %v112_v54 = vsel %vm29_vm13, %v111_v47, %v110_v10  ;;  %v332_v61 = vor.u32 4788187, %v331_v57  ;;  %v335_v62 = vcvt.s32.f32 %v328_v56  ;;  %v535_v63 = vadd.s32 536870912, %v534_v60 }
  0x53   :  { %v115_v30 = vsel %vm1208_vm14, %v1092_v0, %v112_v54  ;;  %v726_v24 = vshll.u32 %v1064_v33, %v714_v59  ;;  %v1281_v14 = vshll.u32 %v1065_v35, %v714_v59  ;;  %v718_v17 = vshrl.u32 %v1062_v29, %v715_v3 }
  0x54   :  { %996 = vcosq.f32 %v115_v30  ;;  %v333_v9 = vand.u32 2147483647, %v332_v61  ;;  %v1283_v15 = vshrl.u32 %v535_v63, 30  ;;  %v721_v18 = vshrl.u32 %v1063_v31, %v715_v3 }
  0x55   :  { %998 = vsinq.f32 %v115_v30  ;;  %vm119_vm9 = vweird.f32 %v1092_v0  ;;  %v724_v8 = vshrl.u32 %v1064_v33, %v715_v3  ;;  %v727_v20 = vshrl.u32 %v1065_v35, %v715_v3 }
  0x56   :  { %v336_v19 = vmul.f32 %v335_v62, %v333_v9  ;;  %v1293_v21 = vshrl.u32 %v1066_v42, %v715_v3  ;;  %v537_v22 = vshll.u32 %v1283_v15, 30  ;;  %v716_v26 = vshrl.u32 %v1061_v27, %v715_v3 }
  0x57   :  { %v719_v36 = vor.u32 %v718_v17, %v717_v6  ;;  %v1297_v38 = vor.u32 %v721_v18, %v720_v34  ;;  %v1299_v39 = vor.u32 %v724_v8, %v723_v12  ;;  %v1301_v31 = vor.u32 %v727_v20, %v726_v24 }
  0x58   :  { %v337_v29 = vxor.u32 2147483648, %v336_v19  ;;  %v731_v33 = vor.u32 %v1293_v21, %v1281_v14  ;;  %vm233_vm10 = vcmp.lt.s32.totalorder %v1261_v37, 2  ;;  %vm234_vm11 = vcmp.eq.s32.totalorder %v1261_v37, 0 }
  0x59   :  { %v1307_v35 = vsub.s32 %v534_v60, %v537_v22  ;;  %v708_v42 = vor.u32 8388608, %v1204_v32  ;;  %vm237_vm12 = vcmp.eq.s32.totalorder %v1261_v37, 2  ;;  %v1313_v10 = vand.u32 3, %v346_v50 }
  0x5a   :  { %v338_v27 = vsel %vm255_vm0, %v337_v29, %v336_v19  ;;  %v1315_v28 = vand.u32 3, %v342_v46  ;;  %vm126_vm13 = vcmp.eq.s32.totalorder %v1274_v58, 2  ;;  %vm732_vm14 = vcmp.lt.s32.totalorder %v1285_v16, 1 }
  0x5b   :  { %v341_v43 = vsel %vm1234_vm5, %v1100_v4, %v338_v27  ;;  %v540_v44 = vsub.s32 0, %v1307_v35  ;;  %vm123_vm15 = vcmp.eq.s32.totalorder %v1274_v58, 0  ;;  %v736_v25 = vsel %vm732_vm14, %v716_v26, %v719_v36 }
  0x5c   :  { %1000 = vcosq.f32 %v341_v43  ;;  %vm122_vm0 = vcmp.lt.s32.totalorder %v1274_v58, 2  ;;  %vm352_vm1 = vcmp.eq.s32.totalorder %v1313_v10, 2  ;;  %vm463_vm2 = vcmp.eq.s32.totalorder %v1315_v28, 2 }
  0x5d   :  { %1002 = vsinq.f32 %v341_v43  ;;  %v954_v48 = vmin.u32 %v540_v44, %v1307_v35  ;;  %v530_v52 = vadd.s32 %v1248_v23, %v1256_v2  ;;  %v1334_v41 = vshll.u32 %v708_v42, 8 }
  0x5e   :  { %v997_v40 = vpop.eup %996  ;;  %vm349_vm3 = vcmp.eq.s32.totalorder %v1313_v10, 0  ;;  %vm460_vm4 = vcmp.eq.s32.totalorder %v1315_v28, 0  ;;  %vm735_vm5 = vcmp.lt.s32.totalorder %v1285_v16, 4  ;;  %vm348_vm6 = vcmp.lt.s32.totalorder %v1313_v10, 2 }
  0x5f   :  { %v999_v32 = vpop.eup %998  ;;  %v127_v45 = vxor.u32 2147483648, %v997_v40  ;;  %v542_v46 = vclz %v954_v48  ;;  %vm459_vm7 = vcmp.lt.s32.totalorder %v1315_v28, 2  ;;  %vm733_vm8 = vcmp.lt.s32.totalorder %v1285_v16, 2 }
  0x60   :  { %v124_v47 = vxor.u32 2147483648, %v999_v32  ;;  %v737_v23 = vsel %vm735_vm5, %v1299_v39, 2102212464  ;;  %v740_v61 = vsel %vm732_vm14, %v719_v36, %v1297_v38  ;;  %v741_v0 = vsel %vm735_vm5, %v1301_v31, 920167782 }
  0x61   :  { %v128_v7 = vsel %vm126_vm13, %v127_v45, %v999_v32  ;;  %v239_v51 = vsel %vm237_vm12, %v127_v45, %v999_v32  ;;  %v955_v37 = vadd.s32 4294967294, %v542_v46  ;;  %v560_v17 = vsub.s32 4, %v1283_v15 }
  0x62   :  { %v125_v53 = vsel %vm123_vm15, %v997_v40, %v124_v47  ;;  %v236_v54 = vsel %vm234_vm11, %v997_v40, %v124_v47  ;;  %vm345_vm11 = vweird.f32 %v1100_v4  ;;  %v744_v19 = vsel %vm732_vm14, %v1297_v38, %v1299_v39 }
  0x63   :  { %v129_v55 = vsel %vm122_vm0, %v125_v53, %v128_v7  ;;  %v240_v30 = vsel %vm233_vm10, %v236_v54, %v239_v51  ;;  %vm734_vm10 = vcmp.lt.s32.totalorder %v1285_v16, 3  ;;  %vm956_vm12 = vcmp.lt.s32.totalorder %v955_v37, 0 }
  0x64   :  { %v130_v2 = vsel %vm119_vm9, nan, %v129_v55  ;;  %v241_v56 = vsel %vm119_vm9, nan, %v240_v30  ;;  %v738_v59 = vsel %vm734_vm10, %v1297_v38, %v737_v23  ;;  %v545_v63 = vsel %vm956_vm12, 0, %v955_v37 }
  0x65   :  { %v133_v57 = vrot.slane %v130_v2, 5  ;;  %v132_v11 = vcombine.high %v130_v2, %v130_v2  ;;  %v244_v58 = vrot.slane %v241_v56, 2  ;;  %v243_v60 = vcombine.high %v241_v56, %v241_v56 }
  0x66   :  { %v739_v3 = vsel %vm733_vm8, %v736_v25, %v738_v59  ;;  %v546_v6 = vsub.s32 32, %v545_v63  ;;  %v547_v34 = vshll.u32 %v1307_v35, %v545_v63  ;;  %v550_v9 = vsub.s32 4294967266, %v545_v63  ;;  %v1001_v24 = vpop.eup %1000 }
  0x67   :  { %137 = vst [vmem:[#allocation5] sm:$0x38] %v133_v57  ;;  %v134_v62 = vrot.slane %v132_v11, 5  ;;  %248 = vst [vmem:[#allocation5 + $0x10] ss:$-12 sps:$4 sm:$0xc1] %v244_v58   ;;  %v742_v12 = vsel %vm734_vm10, %v1299_v39, %v741_v0  ;;  %v1003_v20 = vpop.eup %1002  ;;  %v755_v7 = vmul.u32 %v1334_v41, %v739_v3 }
  0x68   :  { %v245_v50 = vrot.slane %v243_v60, 2  ;;  %v743_v18 = vsel %vm733_vm8, %v740_v61, %v742_v12  ;;  %v745_v8 = vsel %vm735_vm5, %v731_v33, 1326507024  ;;  %v353_v22 = vxor.u32 2147483648, %v1001_v24 }
  0x69   :  { %138 = vst [vmem:[#allocation5 + $0x8] sm:$0x38] %v134_v62  ;;  %v548_v26 = vshrl.u32 %v530_v52, %v546_v6  ;;  %v551_v36 = vadd.s32 127, %v550_v9  ;;  %v746_v29 = vsel %vm734_vm10, %v1301_v31, %v745_v8  ;;  %v350_v35 = vxor.u32 2147483648, %v1003_v20 }
  0x6a   :  { %249 = vst [vmem:[#allocation5 + $0x18] ss:$-12 sps:$4 sm:$0xc1] %v245_v50   ;;  %v747_v42 = vsel %vm733_vm8, %v744_v19, %v746_v29  ;;  %v1390_v38 = vmul.u32.u64.low %v1334_v41, %v743_v18  ;;  %v1391_v39 = vmul.u32.u64.high %v1334_v41, %v743_v18, %v1390_v38  ;;  %v354_v14 = vsel %vm352_vm1, %v353_v22, %v1003_v20 }
  0x6b   :  { %v465_v21 = vsel %vm463_vm2, %v353_v22, %v1003_v20  ;;  %v549_v33 = vor.u32 %v548_v26, %v547_v34  ;;  %v552_v27 = vshll.u32 %v551_v36, 23  ;;  %v351_v40 = vsel %vm349_vm3, %v1001_v24, %v350_v35 }
  0x6c   :  { %v462_v31 = vsel %vm460_vm4, %v1001_v24, %v350_v35  ;;  %v1402_v16 = vmul.u32.u64.low %v1334_v41, %v747_v42  ;;  %v1403_v43 = vmul.u32.u64.high %v1334_v41, %v747_v42, %v1402_v16  ;;  %v355_v44 = vsel %vm348_vm6, %v351_v40, %v354_v14 }
  0x6d   :  { %v466_v32 = vsel %vm459_vm7, %v462_v31, %v465_v21  ;;  %v553_v45 = vor.u32 4788187, %v552_v27  ;;  %v556_v25 = vcvt.s32.f32 %v549_v33  ;;  %v356_v47 = vsel %vm345_vm11, nan, %v355_v44 }
  0x6e   :  { %v467_v48 = vsel %vm345_vm11, nan, %v466_v32  ;;  %v758_v51 = vadd.s32 1, %v1391_v39  ;;  %v359_v52 = vrot.slane %v356_v47, 7  ;;  %v358_v53 = vcombine.high %v356_v47, %v356_v47 }
  0x6f   :  { %v469_v54 = vcombine.low %v467_v48, %v467_v48  ;;  %472 = vst [vmem:[#allocation5 + $0x18] sm:$0x70] %v467_v48  ;;  %v554_v10 = vand.u32 2147483647, %v553_v45  ;;  %v756_v28 = vadd.s32 %v1390_v38, %v1403_v43  ;;  %vm757_vm9 = vc.u32 %v1403_v43, %v1390_v38 }
  0x70   :  { %363 = vst [vmem:[#allocation5 + $0x10] sm:$0xe] %v359_v52  ;;  %v360_v46 = vrot.slane %v358_v53, 7  ;;  %v759_v4 = vsel %vm757_vm9, %v758_v51, %v1391_v39  ;;  %vm476_vm13 = vcmp.lt.s32.totalorder %v1103_v5, 0  ;;  %vm475_vm14 = vcmp.le.f32.partialorder %v474_v49, 0.7853982 }
  0x71   :  { %471 = vst [vmem:[#allocation5 + $0x10] sm:$0x70] %v469_v54  ;;  %v557_v55 = vmul.f32 %v556_v25, %v554_v10  ;;  %v760_v41 = vadd.s32 %v759_v4, %v755_v7  ;;  %v561_v23 = vsel %vm476_vm13, %v560_v17, %v1283_v15  ;;  %vm566_vm5 = vweird.f32 %v1103_v5 }
  0x72   :  { %364 = vst [vmem:[#allocation5 + $0x18] sm:$0xe] %v360_v46  ;;  %v563_v57 = vsel %vm475_vm14, 0, %v561_v23  ;;  %vm702_vm7 = vcmp.lt.s32.totalorder %v1186_v1, 0  ;;  %vm701_vm8 = vcmp.le.f32.partialorder %v700_v13, 0.7853982 }
  0x73   :  { %v558_v30 = vxor.u32 2147483648, %v557_v55  ;;  %v761_v2 = vadd.s32 536870912, %v760_v41  ;;  %v567_v60 = vadd.s32 3, %v563_v57  ;;  %v681_v62 = vand.u32 3, %v563_v57 }
  0x75   :  { %v559_v56 = vsel %vm476_vm13, %v558_v30, %v557_v55  ;;  %v762_v11 = vshrl.u32 %v761_v2, 30  ;;  %v568_v0 = vand.u32 3, %v567_v60  ;;  %vm686_vm0 = vcmp.eq.s32.totalorder %v681_v62, 2 }
  0x76   :  { %v562_v37 = vsel %vm475_vm14, %v1103_v5, %v559_v56  ;;  %vm683_vm2 = vcmp.eq.s32.totalorder %v681_v62, 0  ;;  %vm682_vm4 = vcmp.lt.s32.totalorder %v681_v62, 2 }
  0x77   :  { %1004 = vcosq.f32 %v562_v37  ;;  %v763_v58 = vshll.u32 %v762_v11, 30  ;;  %vm573_vm15 = vcmp.eq.s32.totalorder %v568_v0, 2  ;;  %vm570_vm1 = vcmp.eq.s32.totalorder %v568_v0, 0 }
  0x78   :  { %1006 = vsinq.f32 %v562_v37  ;;  %vm569_vm3 = vcmp.lt.s32.totalorder %v568_v0, 2  ;;  %v786_v44 = vsub.s32 4, %v762_v11 }
  0x79   :  { %v764_v59 = vsub.s32 %v760_v41, %v763_v58 }
  0x7a   :  { %v787_v25 = vsel %vm702_vm7, %v786_v44, %v762_v11 }
  0x7b   :  { %v766_v61 = vsub.s32 0, %v764_v59  ;;  %v789_v7 = vsel %vm701_vm8, 0, %v787_v25 }
  0x7c   :  { %v793_v51 = vadd.s32 3, %v789_v7  ;;  %v905_v53 = vand.u32 3, %v789_v7 }
  0x7d   :  { %v962_v50 = vmin.u32 %v766_v61, %v764_v59 }
  0x7e   :  { %v794_v52 = vand.u32 3, %v793_v51  ;;  %vm910_vm10 = vcmp.eq.s32.totalorder %v905_v53, 2  ;;  %vm907_vm9 = vcmp.eq.s32.totalorder %v905_v53, 0  ;;  %vm906_vm14 = vcmp.lt.s32.totalorder %v905_v53, 2 }
  0x7f   :  { %v768_v63 = vclz %v962_v50 }
  0x80   :  { %vm799_vm11 = vcmp.eq.s32.totalorder %v794_v52, 2  ;;  %vm796_vm12 = vcmp.eq.s32.totalorder %v794_v52, 0  ;;  %vm795_vm13 = vcmp.lt.s32.totalorder %v794_v52, 2 }
  0x81   :  { %v1005_v49 = vpop.eup %1004  ;;  %v963_v6 = vadd.s32 4294967294, %v768_v63 }
  0x82   :  { %v1007_v15 = vpop.eup %1006  ;;  %v574_v3 = vxor.u32 2147483648, %v1005_v49 }
  0x83   :  { %v571_v34 = vxor.u32 2147483648, %v1007_v15  ;;  %vm964_vm6 = vcmp.lt.s32.totalorder %v963_v6, 0 }
  0x84   :  { %v575_v9 = vsel %vm573_vm15, %v574_v3, %v1007_v15  ;;  %v688_v12 = vsel %vm686_vm0, %v574_v3, %v1007_v15  ;;  %v771_v18 = vsel %vm964_vm6, 0, %v963_v6  ;;  %vm792_vm15 = vweird.f32 %v1186_v1 }
  0x85   :  { %v572_v24 = vsel %vm570_vm1, %v1005_v49, %v571_v34  ;;  %v685_v17 = vsel %vm683_vm2, %v1005_v49, %v571_v34  ;;  %v772_v20 = vsub.s32 32, %v771_v18  ;;  %v773_v36 = vshll.u32 %v764_v59, %v771_v18 }
  0x86   :  { %v576_v19 = vsel %vm569_vm3, %v572_v24, %v575_v9  ;;  %v689_v8 = vsel %vm682_vm4, %v685_v17, %v688_v12  ;;  %v776_v29 = vsub.s32 4294967266, %v771_v18 }
  0x87   :  { %v577_v22 = vsel %vm566_vm5, nan, %v576_v19  ;;  %v690_v26 = vsel %vm566_vm5, nan, %v689_v8  ;;  %v774_v14 = vshrl.u32 %v756_v28, %v772_v20 }
  0x88   :  { %v580_v35 = vrot.slane %v577_v22, 1  ;;  %v579_v42 = vcombine.high %v577_v22, %v577_v22  ;;  %v693_v38 = vrot.slane %v690_v26, 6  ;;  %v692_v39 = vcombine.high %v690_v26, %v690_v26 }
  0x89   :  { %v777_v21 = vadd.s32 127, %v776_v29  ;;  %v775_v27 = vor.u32 %v774_v14, %v773_v36 }
  0x8a   :  { %584 = vst [vmem:[#allocation5 + $0x20] ss:$-12 sps:$4 sm:$0x83] %v580_v35   ;;  %v581_v5 = vrot.slane %v579_v42, 1  ;;  %697 = vst [vmem:[#allocation5 + $0x20] sm:$0x1c] %v693_v38 }
  0x8b   :  { %v694_v33 = vrot.slane %v692_v39, 6  ;;  %v778_v40 = vshll.u32 %v777_v21, 23  ;;  %v782_v16 = vcvt.s32.f32 %v775_v27 }
  0x8c   :  { %585 = vst [vmem:[#allocation5 + $0x28] ss:$-12 sps:$4 sm:$0x83] %v581_v5  }
  0x8d   :  { %698 = vst [vmem:[#allocation5 + $0x28] sm:$0x1c] %v694_v33  ;;  %v779_v31 = vor.u32 4788187, %v778_v40 }
  0x8f   :  { %v780_v43 = vand.u32 2147483647, %v779_v31 }
  0x91   :  { %v783_v32 = vmul.f32 %v782_v16, %v780_v43 }
  0x93   :  { %v784_v45 = vxor.u32 2147483648, %v783_v32 }
  0x95   :  { %v785_v47 = vsel %vm702_vm7, %v784_v45, %v783_v32 }
  0x96   :  { %v788_v48 = vsel %vm701_vm8, %v1186_v1, %v785_v47 }
  0x97   :  { %1008 = vcosq.f32 %v788_v48 }
  0x98   :  { %1010 = vsinq.f32 %v788_v48 }
  0xa1   :  { %v1009_v54 = vpop.eup %1008 }
  0xa2   :  { %v1011_v10 = vpop.eup %1010  ;;  %v800_v28 = vxor.u32 2147483648, %v1009_v54 }
  0xa3   :  { %v797_v13 = vxor.u32 2147483648, %v1011_v10 }
  0xa4   :  { %v801_v46 = vsel %vm799_vm11, %v800_v28, %v1011_v10  ;;  %v912_v55 = vsel %vm910_vm10, %v800_v28, %v1011_v10 }
  0xa5   :  { %v798_v4 = vsel %vm796_vm12, %v1009_v54, %v797_v13  ;;  %v909_v41 = vsel %vm907_vm9, %v1009_v54, %v797_v13 }
  0xa6   :  { %v802_v30 = vsel %vm795_vm13, %v798_v4, %v801_v46  ;;  %v913_v23 = vsel %vm906_vm14, %v909_v41, %v912_v55 }
  0xa7   :  { %v803_v2 = vsel %vm792_vm15, nan, %v802_v30  ;;  %v914_v56 = vsel %vm792_vm15, nan, %v913_v23 }
  0xa8   :  { %v806_v37 = vrot.slane %v803_v2, 3  ;;  %v805_v57 = vcombine.high %v803_v2, %v803_v2  ;;  %918 = vst [vmem:[#allocation5 + $0x30] sm:$0x7] %v914_v56  ;;  %v916_v11 = vcombine.high %v914_v56, %v914_v56 }
  0xaa   :  { %810 = vst [vmem:[#allocation5 + $0x20] sm:$0xe0] %v806_v37  ;;  %v807_v58 = vrot.slane %v805_v57, 3  ;;  %919 = vst [vmem:[#allocation5 + $0x38] sm:$0x7] %v916_v11 }
  0xac   :  { %811 = vst [vmem:[#allocation5 + $0x28] sm:$0xe0] %v807_v58 }
  0xad   :  { %1045 = shalt.err (!%p1042_p12)
}
  0xae   :  { %s1046_s22 = scalar_lea.hbm %s1442_s1, 1024 }
  0xaf   :  { %p1047_p13 = scmp.ne.s32.totalorder %s1442_s1, %s1046_s22  ;;  %p1050_p0 = scmp.lt.u32.totalorder %s1046_s22, %s1442_s1 }
  0xb1   :  { %p1052_p1 = pnand %p1050_p0, %p1047_p13 }
  0xb3   :  { %1055 = shalt.err (!%p1052_p1)
}
  0xb4   :  { %s1068_s27 = smov 256   ;;  %s1069_s28 = smov 16  }
  0xb5   :  { %931 = dma.vmem_to_hbm [thread:$0]  %s926_s18, 1024, %s1442_s1, [#allocation4], %s1068_s27, %s1068_s27, %s1069_s28  }
  0xb6   :  { %1058 = dma.done.wait [#allocation4], 1024  }
  0xb7   :  { %1059 = vsyncadd [#allocation4], 4294966272 }
  0xb8   :  { %935 = vsyncpa [#allocation3], 1 }
  0xb9   :  { %936 = vsyncpa [#allocation4], 1 }

</bundles_post_ra>
